<compile_context>
chip_gen: v6e
topology: v6e:2x2x1
jax: 0.10.0
libtpu: 0.0.40
codegen_flags: <defaults>
</compile_context>

<pallas_src>
import functools

import numpy as np
import jax
import jax.numpy as jnp
from jax.experimental import pallas as pl
from jax.experimental.pallas import tpu as pltpu


def _convgru_kernel(hx_ref, mask_ref, w1_ref, w2_ref, b1_ref, out_ref, p_ref,
                    *, Ch, Cxp, W):
    """One core-group per grid step.

    hx_ref  : (1, Ch+Cxp, N)   fused [hidden | zero-padded x]; batch folded
                               into lanes (N = Bg * H * W)
    mask_ref: (9, N)           per-tap 0/1 border masks (rows = ky*3+kx)
    w1_ref  : (3*Ch, 9*(Ch+Cxp)) packed weights, row blocks [z | r | q_x-only]
    w2_ref  : (Ch, 9*Ch)       packed q-gate weights for the h taps
    b1_ref  : (3*Ch, 1)        biases [bz | br | bq]
    out_ref : (1, Ch, N)       new hidden state
    p_ref   : (9*(Ch+Cxp), N)  f32 VMEM scratch holding the im2col patches
                               (rows [0, 9*Ch): h / rh taps, rest: x taps)
    """
    Chx = Ch + Cxp
    KH = 9 * Ch
    N = hx_ref.shape[-1]

    hx = hx_ref[0]                    # (Chx, N)
    h = hx[:Ch]                       # (Ch, N)
    mask = mask_ref[...]              # (9, N)

    # Tap (ky, kx) needs in[y+ky-1, x+kx-1] -> read at fused lane offset
    # off = (ky-1)*W + (kx-1) -> circular roll by -off (XLU).  Every border
    # (and cross-batch) wrap lands on a zero-masked position, so the result
    # matches zero "SAME" padding.
    shifts = [(-((ky - 1) * W + (kx - 1))) % N
              for ky in range(3) for kx in range(3)]

    # ---- stage 1: im2col of [h | x] into the scratch (aligned 8-row chunks).
    for t, s in enumerate(shifts):
        if s == 0:
            v = hx                                     # center tap, mask == 1
        else:
            v = pltpu.roll(hx, shift=s, axis=1) * mask[t]
        p_ref[t * Ch:(t + 1) * Ch, :] = v[:Ch]
        p_ref[KH + t * Cxp:KH + (t + 1) * Cxp, :] = v[Ch:]

    # ---- fused gate matmul: rows = [z | r | q_x partial], one MXU call.
    a1 = jnp.dot(w1_ref[...], p_ref[...],
                 preferred_element_type=jnp.float32) + b1_ref[...]
    z = jax.nn.sigmoid(a1[:Ch])
    r = jax.nn.sigmoid(a1[Ch:2 * Ch])
    qx = a1[2 * Ch:]                  # wq_x @ x-patches + bq (pre-activation)

    # ---- stage 2: im2col of r*h overwrites the h-patch rows of the scratch.
    rh = r * h
    for t, s in enumerate(shifts):
        if s == 0:
            v = rh
        else:
            v = pltpu.roll(rh, shift=s, axis=1) * mask[t]
        p_ref[t * Ch:(t + 1) * Ch, :] = v

    q = jnp.tanh(jnp.dot(w2_ref[...], p_ref[:KH, :],
                         preferred_element_type=jnp.float32) + qx)

    out_ref[0] = (1.0 - z) * h + z * q


def _num_batch_groups(batch):
    # v7x has two TensorCores per chip -> split the batch across them; the
    # single-TC v5e/v6e prefer one wide grid step (batch fully in lanes).
    try:
        kind = jax.devices()[0].device_kind.lower().replace(" ", "")
    except Exception:
        kind = ""
    if batch % 2 == 0 and ("v7" in kind or "tpu7" in kind):
        return 2
    return 1


def _pack_tap_major(w_oihw):
    # (Co, Cin, 3, 3) -> (Co, 9*Cin), columns ordered (tap, cin) to match the
    # patch-row ordering written by the kernel.
    co = w_oihw.shape[0]
    return jnp.transpose(w_oihw, (0, 2, 3, 1)).reshape(co, -1)


def conv_gru_pallas(last_hidden_nchw, x_nchw, params):
    """ConvGRU forward. Inputs NCHW (PyTorch layout), output NCHW."""
    B, Ch, H, W = last_hidden_nchw.shape
    _, Cx, _, _ = x_nchw.shape
    HW = H * W
    assert Ch % 8 == 0, "hidden_planes must be a multiple of 8 (sublane tile)"

    Cxp = max(8, -(-Cx // 8) * 8)          # pad x channels to a sublane tile
    Chx = Ch + Cxp

    G = _num_batch_groups(B)               # core groups = grid size
    Bg = B // G                            # batch elements folded into lanes
    N = Bg * HW

    # ---- inputs: NCHW -> (G, Chx, N), batch folded into the lane axis.
    h2 = last_hidden_nchw.reshape(B, Ch, HW).astype(jnp.float32)
    x2 = x_nchw.reshape(B, Cx, HW).astype(jnp.float32)
    x2 = jnp.pad(x2, ((0, 0), (0, Cxp - Cx), (0, 0)))
    hx = jnp.concatenate([h2, x2], axis=1)                     # (B, Chx, HW)
    hx = hx.reshape(G, Bg, Chx, HW).transpose(0, 2, 1, 3).reshape(G, Chx, N)

    # ---- per-tap 0/1 border masks (constants), tiled per folded batch elem.
    yy, xx = np.meshgrid(np.arange(H), np.arange(W), indexing="ij")
    yy = yy.reshape(-1)
    xx = xx.reshape(-1)
    masks_np = np.zeros((9, HW), np.float32)
    for ky in range(3):
        for kx in range(3):
            dy, dx = ky - 1, kx - 1
            masks_np[ky * 3 + kx] = ((yy + dy >= 0) & (yy + dy < H) &
                                     (xx + dx >= 0) & (xx + dx < W))
    masks = jnp.asarray(np.tile(masks_np, (1, Bg)))             # (9, N)

    # ---- weight packing: rows [z | r | q_x-only] for matmul 1, q_h for 2.
    def split_pack(w):
        w_h = w[:, :Ch]
        w_x = jnp.pad(w[:, Ch:], ((0, 0), (0, Cxp - Cx), (0, 0), (0, 0)))
        return _pack_tap_major(w_h), _pack_tap_major(w_x)

    wz_h, wz_x = split_pack(params["wz"])
    wr_h, wr_x = split_pack(params["wr"])
    wq_h, wq_x = split_pack(params["wq"])

    w1 = jnp.concatenate(
        [jnp.concatenate([wz_h, wz_x], axis=1),
         jnp.concatenate([wr_h, wr_x], axis=1),
         jnp.concatenate([jnp.zeros_like(wq_h), wq_x], axis=1)],
        axis=0).astype(jnp.float32)                             # (3Ch, 9*Chx)
    w2 = wq_h.astype(jnp.float32)                               # (Ch, 9*Ch)
    b1 = jnp.concatenate([params["bz"], params["br"], params["bq"]]
                         ).reshape(3 * Ch, 1).astype(jnp.float32)

    kernel = functools.partial(_convgru_kernel, Ch=Ch, Cxp=Cxp, W=W)

    out = pl.pallas_call(
        kernel,
        out_shape=jax.ShapeDtypeStruct((G, Ch, N), jnp.float32),
        grid=(G,),
        in_specs=[
            pl.BlockSpec((1, Chx, N), lambda g: (g, 0, 0)),
            pl.BlockSpec((9, N), lambda g: (0, 0)),
            pl.BlockSpec((3 * Ch, 9 * Chx), lambda g: (0, 0)),
            pl.BlockSpec((Ch, 9 * Ch), lambda g: (0, 0)),
            pl.BlockSpec((3 * Ch, 1), lambda g: (0, 0)),
        ],
        out_specs=pl.BlockSpec((1, Ch, N), lambda g: (g, 0, 0)),
        scratch_shapes=[pltpu.VMEM((9 * Chx, N), jnp.float32)],
        compiler_params=pltpu.CompilerParams(
            dimension_semantics=("parallel",)),
    )(hx, masks, w1, w2, b1)

    # (G, Ch, N) -> NCHW (tiny arrays; a free reshape when Bg == 1).
    return out.reshape(G, Ch, Bg, HW).transpose(0, 2, 1, 3).reshape(B, Ch, H, W)


# ----------------------------- pure-JAX reference ---------------------------
def _ref_conv(x_nchw, w_oihw, b):
    y = jax.lax.conv_general_dilated(
        x_nchw, w_oihw, window_strides=(1, 1), padding="SAME",
        dimension_numbers=("NCHW", "OIHW", "NCHW"))
    return y + b[None, :, None, None]


def conv_gru_reference(h, x, params):
    hx = jnp.concatenate([h, x], axis=1)
    z = jax.nn.sigmoid(_ref_conv(hx, params["wz"], params["bz"]))
    r = jax.nn.sigmoid(_ref_conv(hx, params["wr"], params["br"]))
    rhx = jnp.concatenate([r * h, x], axis=1)
    q = jnp.tanh(_ref_conv(rhx, params["wq"], params["bq"]))
    return (1.0 - z) * h + z * q


# --------------------------------- main --------------------------------------
if __name__ == "__main__":
    B, in_planes, hidden_planes, H, W = 2, 4, 8, 16, 16
    fuse = in_planes + hidden_planes

    key = jax.random.PRNGKey(0)
    k = jax.random.split(key, 8)

    last_hidden = jax.random.normal(k[0], (B, hidden_planes, H, W), jnp.float32)
    x = jax.random.normal(k[1], (B, in_planes, H, W), jnp.float32)

    # Deterministic synthetic parameters (PyTorch Conv2d shapes: OIHW + bias).
    params = {
        "wz": 0.1 * jax.random.normal(k[2], (hidden_planes, fuse, 3, 3), jnp.float32),
        "wr": 0.1 * jax.random.normal(k[3], (hidden_planes, fuse, 3, 3), jnp.float32),
        "wq": 0.1 * jax.random.normal(k[4], (hidden_planes, fuse, 3, 3), jnp.float32),
        "bz": 0.1 * jax.random.normal(k[5], (hidden_planes,), jnp.float32),
        "br": 0.1 * jax.random.normal(k[6], (hidden_planes,), jnp.float32),
        "bq": 0.1 * jax.random.normal(k[7], (hidden_planes,), jnp.float32),
    }

    out = jax.jit(conv_gru_pallas)(last_hidden, x, params)
    out = jax.block_until_ready(out)

    ref = conv_gru_reference(last_hidden, x, params)
    assert out.shape == (B, hidden_planes, H, W)
    err = float(jnp.max(jnp.abs(out - ref)))
    # Tolerance covers MXU reduced-precision f32 paths on any TPU generation.
    assert err < 2e-2, f"max abs err = {err}"

    print("KERNEL_OK")
</pallas_src>

<mosaic_0001>
module attributes {stable_mosaic.version = 11 : i64} {
  func.func @_convgru_kernel(%arg0: i32, %arg1: memref<1x16x512xf32, #tpu.memory_space<vmem>>, %arg2: memref<9x512xf32, #tpu.memory_space<vmem>>, %arg3: memref<24x144xf32, #tpu.memory_space<vmem>>, %arg4: memref<8x72xf32, #tpu.memory_space<vmem>>, %arg5: memref<24x1xf32, #tpu.memory_space<vmem>>, %arg6: memref<1x8x512xf32, #tpu.memory_space<vmem>>, %arg7: memref<144x512xf32, #tpu.memory_space<vmem>>) attributes {dimension_semantics = [#tpu.dimension_semantics<parallel>], iteration_bounds = array<i64: 1>, scalar_prefetch = 0 : i64, scratch_operands = 1 : i64, tpu.core_type = #tpu.core_type<tc>, window_params = [{transform_indices = @transform_0, window_bounds = array<i64: 1, 16, 512>}, {pipeline_mode = #tpu.pipeline_mode<synchronous>, transform_indices = @transform_1, window_bounds = array<i64: 9, 512>}, {pipeline_mode = #tpu.pipeline_mode<synchronous>, transform_indices = @transform_2, window_bounds = array<i64: 24, 144>}, {pipeline_mode = #tpu.pipeline_mode<synchronous>, transform_indices = @transform_3, window_bounds = array<i64: 8, 72>}, {pipeline_mode = #tpu.pipeline_mode<synchronous>, transform_indices = @transform_4, window_bounds = array<i64: 24, 1>}, {transform_indices = @transform_5, window_bounds = array<i64: 1, 8, 512>}]} {
    %c0 = arith.constant 0 : index
    %c0_0 = arith.constant 0 : index
    %c0_1 = arith.constant 0 : index
    %0 = vector.load %arg1[%c0, %c0_0, %c0_1] : memref<1x16x512xf32, #tpu.memory_space<vmem>>, vector<1x16x512xf32>
    %1 = vector.shape_cast %0 : vector<1x16x512xf32> to vector<16x512xf32>
    %2 = vector.extract_strided_slice %1 {offsets = [0, 0], sizes = [8, 512], strides = [1, 1]} : vector<16x512xf32> to vector<8x512xf32>
    %c0_2 = arith.constant 0 : index
    %c0_3 = arith.constant 0 : index
    %3 = vector.load %arg2[%c0_2, %c0_3] : memref<9x512xf32, #tpu.memory_space<vmem>>, vector<9x512xf32>
    %c17_i32 = arith.constant 17 : i32
    %4 = tpu.dynamic_rotate %1 by %c17_i32 dim 1 : vector<16x512xf32>, i32 -> vector<16x512xf32>
    %5 = vector.extract_strided_slice %3 {offsets = [0, 0], sizes = [1, 512], strides = [1, 1]} : vector<9x512xf32> to vector<1x512xf32>
    %6 = vector.shape_cast %5 : vector<1x512xf32> to vector<512xf32>
    %7 = vector.shape_cast %6 : vector<512xf32> to vector<1x512xf32>
    %8 = vector.broadcast %7 : vector<1x512xf32> to vector<16x512xf32>
    %9 = arith.mulf %4, %8 : vector<16x512xf32>
    %10 = vector.extract_strided_slice %9 {offsets = [0, 0], sizes = [8, 512], strides = [1, 1]} : vector<16x512xf32> to vector<8x512xf32>
    %c0_4 = arith.constant 0 : index
    %c0_5 = arith.constant 0 : index
    %11 = vector.load %arg7[%c0_4, %c0_5] : memref<144x512xf32, #tpu.memory_space<vmem>>, vector<8x512xf32>
    tpu.vector_store %arg7[%c0_4, %c0_5], %10 {strides = array<i32>} : memref<144x512xf32, #tpu.memory_space<vmem>>, vector<8x512xf32>,
    %12 = vector.extract_strided_slice %9 {offsets = [8, 0], sizes = [8, 512], strides = [1, 1]} : vector<16x512xf32> to vector<8x512xf32>
    %c72 = arith.constant 72 : index
    %c0_6 = arith.constant 0 : index
    %13 = vector.load %arg7[%c72, %c0_6] : memref<144x512xf32, #tpu.memory_space<vmem>>, vector<8x512xf32>
    tpu.vector_store %arg7[%c72, %c0_6], %12 {strides = array<i32>} : memref<144x512xf32, #tpu.memory_space<vmem>>, vector<8x512xf32>,
    %c16_i32 = arith.constant 16 : i32
    %14 = tpu.dynamic_rotate %1 by %c16_i32 dim 1 : vector<16x512xf32>, i32 -> vector<16x512xf32>
    %15 = vector.extract_strided_slice %3 {offsets = [1, 0], sizes = [1, 512], strides = [1, 1]} : vector<9x512xf32> to vector<1x512xf32>
    %16 = vector.shape_cast %15 : vector<1x512xf32> to vector<512xf32>
    %17 = vector.shape_cast %16 : vector<512xf32> to vector<1x512xf32>
    %18 = vector.broadcast %17 : vector<1x512xf32> to vector<16x512xf32>
    %19 = arith.mulf %14, %18 : vector<16x512xf32>
    %20 = vector.extract_strided_slice %19 {offsets = [0, 0], sizes = [8, 512], strides = [1, 1]} : vector<16x512xf32> to vector<8x512xf32>
    %c8 = arith.constant 8 : index
    %c0_7 = arith.constant 0 : index
    %21 = vector.load %arg7[%c8, %c0_7] : memref<144x512xf32, #tpu.memory_space<vmem>>, vector<8x512xf32>
    tpu.vector_store %arg7[%c8, %c0_7], %20 {strides = array<i32>} : memref<144x512xf32, #tpu.memory_space<vmem>>, vector<8x512xf32>,
    %22 = vector.extract_strided_slice %19 {offsets = [8, 0], sizes = [8, 512], strides = [1, 1]} : vector<16x512xf32> to vector<8x512xf32>
    %c80 = arith.constant 80 : index
    %c0_8 = arith.constant 0 : index
    %23 = vector.load %arg7[%c80, %c0_8] : memref<144x512xf32, #tpu.memory_space<vmem>>, vector<8x512xf32>
    tpu.vector_store %arg7[%c80, %c0_8], %22 {strides = array<i32>} : memref<144x512xf32, #tpu.memory_space<vmem>>, vector<8x512xf32>,
    %c15_i32 = arith.constant 15 : i32
    %24 = tpu.dynamic_rotate %1 by %c15_i32 dim 1 : vector<16x512xf32>, i32 -> vector<16x512xf32>
    %25 = vector.extract_strided_slice %3 {offsets = [2, 0], sizes = [1, 512], strides = [1, 1]} : vector<9x512xf32> to vector<1x512xf32>
    %26 = vector.shape_cast %25 : vector<1x512xf32> to vector<512xf32>
    %27 = vector.shape_cast %26 : vector<512xf32> to vector<1x512xf32>
    %28 = vector.broadcast %27 : vector<1x512xf32> to vector<16x512xf32>
    %29 = arith.mulf %24, %28 : vector<16x512xf32>
    %30 = vector.extract_strided_slice %29 {offsets = [0, 0], sizes = [8, 512], strides = [1, 1]} : vector<16x512xf32> to vector<8x512xf32>
    %c16 = arith.constant 16 : index
    %c0_9 = arith.constant 0 : index
    %31 = vector.load %arg7[%c16, %c0_9] : memref<144x512xf32, #tpu.memory_space<vmem>>, vector<8x512xf32>
    tpu.vector_store %arg7[%c16, %c0_9], %30 {strides = array<i32>} : memref<144x512xf32, #tpu.memory_space<vmem>>, vector<8x512xf32>,
    %32 = vector.extract_strided_slice %29 {offsets = [8, 0], sizes = [8, 512], strides = [1, 1]} : vector<16x512xf32> to vector<8x512xf32>
    %c88 = arith.constant 88 : index
    %c0_10 = arith.constant 0 : index
    %33 = vector.load %arg7[%c88, %c0_10] : memref<144x512xf32, #tpu.memory_space<vmem>>, vector<8x512xf32>
    tpu.vector_store %arg7[%c88, %c0_10], %32 {strides = array<i32>} : memref<144x512xf32, #tpu.memory_space<vmem>>, vector<8x512xf32>,
    %c1_i32 = arith.constant 1 : i32
    %34 = tpu.dynamic_rotate %1 by %c1_i32 dim 1 : vector<16x512xf32>, i32 -> vector<16x512xf32>
    %35 = vector.extract_strided_slice %3 {offsets = [3, 0], sizes = [1, 512], strides = [1, 1]} : vector<9x512xf32> to vector<1x512xf32>
    %36 = vector.shape_cast %35 : vector<1x512xf32> to vector<512xf32>
    %37 = vector.shape_cast %36 : vector<512xf32> to vector<1x512xf32>
    %38 = vector.broadcast %37 : vector<1x512xf32> to vector<16x512xf32>
    %39 = arith.mulf %34, %38 : vector<16x512xf32>
    %40 = vector.extract_strided_slice %39 {offsets = [0, 0], sizes = [8, 512], strides = [1, 1]} : vector<16x512xf32> to vector<8x512xf32>
    %c24 = arith.constant 24 : index
    %c0_11 = arith.constant 0 : index
    %41 = vector.load %arg7[%c24, %c0_11] : memref<144x512xf32, #tpu.memory_space<vmem>>, vector<8x512xf32>
    tpu.vector_store %arg7[%c24, %c0_11], %40 {strides = array<i32>} : memref<144x512xf32, #tpu.memory_space<vmem>>, vector<8x512xf32>,
    %42 = vector.extract_strided_slice %39 {offsets = [8, 0], sizes = [8, 512], strides = [1, 1]} : vector<16x512xf32> to vector<8x512xf32>
    %c96 = arith.constant 96 : index
    %c0_12 = arith.constant 0 : index
    %43 = vector.load %arg7[%c96, %c0_12] : memref<144x512xf32, #tpu.memory_space<vmem>>, vector<8x512xf32>
    tpu.vector_store %arg7[%c96, %c0_12], %42 {strides = array<i32>} : memref<144x512xf32, #tpu.memory_space<vmem>>, vector<8x512xf32>,
    %44 = vector.extract_strided_slice %1 {offsets = [0, 0], sizes = [8, 512], strides = [1, 1]} : vector<16x512xf32> to vector<8x512xf32>
    %c32 = arith.constant 32 : index
    %c0_13 = arith.constant 0 : index
    %45 = vector.load %arg7[%c32, %c0_13] : memref<144x512xf32, #tpu.memory_space<vmem>>, vector<8x512xf32>
    tpu.vector_store %arg7[%c32, %c0_13], %44 {strides = array<i32>} : memref<144x512xf32, #tpu.memory_space<vmem>>, vector<8x512xf32>,
    %46 = vector.extract_strided_slice %1 {offsets = [8, 0], sizes = [8, 512], strides = [1, 1]} : vector<16x512xf32> to vector<8x512xf32>
    %c104 = arith.constant 104 : index
    %c0_14 = arith.constant 0 : index
    %47 = vector.load %arg7[%c104, %c0_14] : memref<144x512xf32, #tpu.memory_space<vmem>>, vector<8x512xf32>
    tpu.vector_store %arg7[%c104, %c0_14], %46 {strides = array<i32>} : memref<144x512xf32, #tpu.memory_space<vmem>>, vector<8x512xf32>,
    %c511_i32 = arith.constant 511 : i32
    %48 = tpu.dynamic_rotate %1 by %c511_i32 dim 1 : vector<16x512xf32>, i32 -> vector<16x512xf32>
    %49 = vector.extract_strided_slice %3 {offsets = [5, 0], sizes = [1, 512], strides = [1, 1]} : vector<9x512xf32> to vector<1x512xf32>
    %50 = vector.shape_cast %49 : vector<1x512xf32> to vector<512xf32>
    %51 = vector.shape_cast %50 : vector<512xf32> to vector<1x512xf32>
    %52 = vector.broadcast %51 : vector<1x512xf32> to vector<16x512xf32>
    %53 = arith.mulf %48, %52 : vector<16x512xf32>
    %54 = vector.extract_strided_slice %53 {offsets = [0, 0], sizes = [8, 512], strides = [1, 1]} : vector<16x512xf32> to vector<8x512xf32>
    %c40 = arith.constant 40 : index
    %c0_15 = arith.constant 0 : index
    %55 = vector.load %arg7[%c40, %c0_15] : memref<144x512xf32, #tpu.memory_space<vmem>>, vector<8x512xf32>
    tpu.vector_store %arg7[%c40, %c0_15], %54 {strides = array<i32>} : memref<144x512xf32, #tpu.memory_space<vmem>>, vector<8x512xf32>,
    %56 = vector.extract_strided_slice %53 {offsets = [8, 0], sizes = [8, 512], strides = [1, 1]} : vector<16x512xf32> to vector<8x512xf32>
    %c112 = arith.constant 112 : index
    %c0_16 = arith.constant 0 : index
    %57 = vector.load %arg7[%c112, %c0_16] : memref<144x512xf32, #tpu.memory_space<vmem>>, vector<8x512xf32>
    tpu.vector_store %arg7[%c112, %c0_16], %56 {strides = array<i32>} : memref<144x512xf32, #tpu.memory_space<vmem>>, vector<8x512xf32>,
    %c497_i32 = arith.constant 497 : i32
    %58 = tpu.dynamic_rotate %1 by %c497_i32 dim 1 : vector<16x512xf32>, i32 -> vector<16x512xf32>
    %59 = vector.extract_strided_slice %3 {offsets = [6, 0], sizes = [1, 512], strides = [1, 1]} : vector<9x512xf32> to vector<1x512xf32>
    %60 = vector.shape_cast %59 : vector<1x512xf32> to vector<512xf32>
    %61 = vector.shape_cast %60 : vector<512xf32> to vector<1x512xf32>
    %62 = vector.broadcast %61 : vector<1x512xf32> to vector<16x512xf32>
    %63 = arith.mulf %58, %62 : vector<16x512xf32>
    %64 = vector.extract_strided_slice %63 {offsets = [0, 0], sizes = [8, 512], strides = [1, 1]} : vector<16x512xf32> to vector<8x512xf32>
    %c48 = arith.constant 48 : index
    %c0_17 = arith.constant 0 : index
    %65 = vector.load %arg7[%c48, %c0_17] : memref<144x512xf32, #tpu.memory_space<vmem>>, vector<8x512xf32>
    tpu.vector_store %arg7[%c48, %c0_17], %64 {strides = array<i32>} : memref<144x512xf32, #tpu.memory_space<vmem>>, vector<8x512xf32>,
    %66 = vector.extract_strided_slice %63 {offsets = [8, 0], sizes = [8, 512], strides = [1, 1]} : vector<16x512xf32> to vector<8x512xf32>
    %c120 = arith.constant 120 : index
    %c0_18 = arith.constant 0 : index
    %67 = vector.load %arg7[%c120, %c0_18] : memref<144x512xf32, #tpu.memory_space<vmem>>, vector<8x512xf32>
    tpu.vector_store %arg7[%c120, %c0_18], %66 {strides = array<i32>} : memref<144x512xf32, #tpu.memory_space<vmem>>, vector<8x512xf32>,
    %c496_i32 = arith.constant 496 : i32
    %68 = tpu.dynamic_rotate %1 by %c496_i32 dim 1 : vector<16x512xf32>, i32 -> vector<16x512xf32>
    %69 = vector.extract_strided_slice %3 {offsets = [7, 0], sizes = [1, 512], strides = [1, 1]} : vector<9x512xf32> to vector<1x512xf32>
    %70 = vector.shape_cast %69 : vector<1x512xf32> to vector<512xf32>
    %71 = vector.shape_cast %70 : vector<512xf32> to vector<1x512xf32>
    %72 = vector.broadcast %71 : vector<1x512xf32> to vector<16x512xf32>
    %73 = arith.mulf %68, %72 : vector<16x512xf32>
    %74 = vector.extract_strided_slice %73 {offsets = [0, 0], sizes = [8, 512], strides = [1, 1]} : vector<16x512xf32> to vector<8x512xf32>
    %c56 = arith.constant 56 : index
    %c0_19 = arith.constant 0 : index
    %75 = vector.load %arg7[%c56, %c0_19] : memref<144x512xf32, #tpu.memory_space<vmem>>, vector<8x512xf32>
    tpu.vector_store %arg7[%c56, %c0_19], %74 {strides = array<i32>} : memref<144x512xf32, #tpu.memory_space<vmem>>, vector<8x512xf32>,
    %76 = vector.extract_strided_slice %73 {offsets = [8, 0], sizes = [8, 512], strides = [1, 1]} : vector<16x512xf32> to vector<8x512xf32>
    %c128 = arith.constant 128 : index
    %c0_20 = arith.constant 0 : index
    %77 = vector.load %arg7[%c128, %c0_20] : memref<144x512xf32, #tpu.memory_space<vmem>>, vector<8x512xf32>
    tpu.vector_store %arg7[%c128, %c0_20], %76 {strides = array<i32>} : memref<144x512xf32, #tpu.memory_space<vmem>>, vector<8x512xf32>,
    %c495_i32 = arith.constant 495 : i32
    %78 = tpu.dynamic_rotate %1 by %c495_i32 dim 1 : vector<16x512xf32>, i32 -> vector<16x512xf32>
    %79 = vector.extract_strided_slice %3 {offsets = [8, 0], sizes = [1, 512], strides = [1, 1]} : vector<9x512xf32> to vector<1x512xf32>
    %80 = vector.shape_cast %79 : vector<1x512xf32> to vector<512xf32>
    %81 = vector.shape_cast %80 : vector<512xf32> to vector<1x512xf32>
    %82 = vector.broadcast %81 : vector<1x512xf32> to vector<16x512xf32>
    %83 = arith.mulf %78, %82 : vector<16x512xf32>
    %84 = vector.extract_strided_slice %83 {offsets = [0, 0], sizes = [8, 512], strides = [1, 1]} : vector<16x512xf32> to vector<8x512xf32>
    %c64 = arith.constant 64 : index
    %c0_21 = arith.constant 0 : index
    %85 = vector.load %arg7[%c64, %c0_21] : memref<144x512xf32, #tpu.memory_space<vmem>>, vector<8x512xf32>
    tpu.vector_store %arg7[%c64, %c0_21], %84 {strides = array<i32>} : memref<144x512xf32, #tpu.memory_space<vmem>>, vector<8x512xf32>,
    %86 = vector.extract_strided_slice %83 {offsets = [8, 0], sizes = [8, 512], strides = [1, 1]} : vector<16x512xf32> to vector<8x512xf32>
    %c136 = arith.constant 136 : index
    %c0_22 = arith.constant 0 : index
    %87 = vector.load %arg7[%c136, %c0_22] : memref<144x512xf32, #tpu.memory_space<vmem>>, vector<8x512xf32>
    tpu.vector_store %arg7[%c136, %c0_22], %86 {strides = array<i32>} : memref<144x512xf32, #tpu.memory_space<vmem>>, vector<8x512xf32>,
    %c0_23 = arith.constant 0 : index
    %c0_24 = arith.constant 0 : index
    %88 = vector.load %arg3[%c0_23, %c0_24] : memref<24x144xf32, #tpu.memory_space<vmem>>, vector<24x144xf32>
    %c0_25 = arith.constant 0 : index
    %c0_26 = arith.constant 0 : index
    %89 = vector.load %arg7[%c0_25, %c0_26] : memref<144x512xf32, #tpu.memory_space<vmem>>, vector<144x512xf32>
    %cst = arith.constant dense<0.000000e+00> : vector<24x512xf32>
    %90 = tpu.matmul %88, %89, %cst {dimension_numbers = #tpu.dot_dimension_numbers<[1], [0], [0], [1], [0, 0, 1, 1], [], []>} : vector<24x144xf32>, vector<144x512xf32>, vector<24x512xf32> -> vector<24x512xf32>
    %c0_27 = arith.constant 0 : index
    %c0_28 = arith.constant 0 : index
    %91 = vector.load %arg5[%c0_27, %c0_28] : memref<24x1xf32, #tpu.memory_space<vmem>>, vector<24x1xf32>
    %92 = vector.broadcast %91 : vector<24x1xf32> to vector<24x512xf32>
    %93 = arith.addf %90, %92 : vector<24x512xf32>
    %94 = vector.extract_strided_slice %93 {offsets = [0, 0], sizes = [8, 512], strides = [1, 1]} : vector<24x512xf32> to vector<8x512xf32>
    %95 = arith.negf %94 : vector<8x512xf32>
    %96 = math.exp %95 : vector<8x512xf32>
    %cst_29 = arith.constant 1.000000e+00 : f32
    %97 = vector.broadcast %cst_29 : f32 to vector<8x512xf32>
    %98 = arith.addf %97, %96 : vector<8x512xf32>
    %99 = arith.divf %97, %98 : vector<8x512xf32>
    %100 = vector.extract_strided_slice %93 {offsets = [8, 0], sizes = [8, 512], strides = [1, 1]} : vector<24x512xf32> to vector<8x512xf32>
    %101 = arith.negf %100 : vector<8x512xf32>
    %102 = math.exp %101 : vector<8x512xf32>
    %cst_30 = arith.constant 1.000000e+00 : f32
    %103 = vector.broadcast %cst_30 : f32 to vector<8x512xf32>
    %104 = arith.addf %103, %102 : vector<8x512xf32>
    %105 = arith.divf %103, %104 : vector<8x512xf32>
    %106 = vector.extract_strided_slice %93 {offsets = [16, 0], sizes = [8, 512], strides = [1, 1]} : vector<24x512xf32> to vector<8x512xf32>
    %107 = arith.mulf %105, %2 : vector<8x512xf32>
    %c17_i32_31 = arith.constant 17 : i32
    %108 = tpu.dynamic_rotate %107 by %c17_i32_31 dim 1 : vector<8x512xf32>, i32 -> vector<8x512xf32>
    %109 = vector.extract_strided_slice %3 {offsets = [0, 0], sizes = [1, 512], strides = [1, 1]} : vector<9x512xf32> to vector<1x512xf32>
    %110 = vector.shape_cast %109 : vector<1x512xf32> to vector<512xf32>
    %111 = vector.shape_cast %110 : vector<512xf32> to vector<1x512xf32>
    %112 = vector.broadcast %111 : vector<1x512xf32> to vector<8x512xf32>
    %113 = arith.mulf %108, %112 : vector<8x512xf32>
    %c0_32 = arith.constant 0 : index
    %c0_33 = arith.constant 0 : index
    %114 = vector.load %arg7[%c0_32, %c0_33] : memref<144x512xf32, #tpu.memory_space<vmem>>, vector<8x512xf32>
    tpu.vector_store %arg7[%c0_32, %c0_33], %113 {strides = array<i32>} : memref<144x512xf32, #tpu.memory_space<vmem>>, vector<8x512xf32>,
    %c16_i32_34 = arith.constant 16 : i32
    %115 = tpu.dynamic_rotate %107 by %c16_i32_34 dim 1 : vector<8x512xf32>, i32 -> vector<8x512xf32>
    %116 = vector.extract_strided_slice %3 {offsets = [1, 0], sizes = [1, 512], strides = [1, 1]} : vector<9x512xf32> to vector<1x512xf32>
    %117 = vector.shape_cast %116 : vector<1x512xf32> to vector<512xf32>
    %118 = vector.shape_cast %117 : vector<512xf32> to vector<1x512xf32>
    %119 = vector.broadcast %118 : vector<1x512xf32> to vector<8x512xf32>
    %120 = arith.mulf %115, %119 : vector<8x512xf32>
    %c8_35 = arith.constant 8 : index
    %c0_36 = arith.constant 0 : index
    %121 = vector.load %arg7[%c8_35, %c0_36] : memref<144x512xf32, #tpu.memory_space<vmem>>, vector<8x512xf32>
    tpu.vector_store %arg7[%c8_35, %c0_36], %120 {strides = array<i32>} : memref<144x512xf32, #tpu.memory_space<vmem>>, vector<8x512xf32>,
    %c15_i32_37 = arith.constant 15 : i32
    %122 = tpu.dynamic_rotate %107 by %c15_i32_37 dim 1 : vector<8x512xf32>, i32 -> vector<8x512xf32>
    %123 = vector.extract_strided_slice %3 {offsets = [2, 0], sizes = [1, 512], strides = [1, 1]} : vector<9x512xf32> to vector<1x512xf32>
    %124 = vector.shape_cast %123 : vector<1x512xf32> to vector<512xf32>
    %125 = vector.shape_cast %124 : vector<512xf32> to vector<1x512xf32>
    %126 = vector.broadcast %125 : vector<1x512xf32> to vector<8x512xf32>
    %127 = arith.mulf %122, %126 : vector<8x512xf32>
    %c16_38 = arith.constant 16 : index
    %c0_39 = arith.constant 0 : index
    %128 = vector.load %arg7[%c16_38, %c0_39] : memref<144x512xf32, #tpu.memory_space<vmem>>, vector<8x512xf32>
    tpu.vector_store %arg7[%c16_38, %c0_39], %127 {strides = array<i32>} : memref<144x512xf32, #tpu.memory_space<vmem>>, vector<8x512xf32>,
    %c1_i32_40 = arith.constant 1 : i32
    %129 = tpu.dynamic_rotate %107 by %c1_i32_40 dim 1 : vector<8x512xf32>, i32 -> vector<8x512xf32>
    %130 = vector.extract_strided_slice %3 {offsets = [3, 0], sizes = [1, 512], strides = [1, 1]} : vector<9x512xf32> to vector<1x512xf32>
    %131 = vector.shape_cast %130 : vector<1x512xf32> to vector<512xf32>
    %132 = vector.shape_cast %131 : vector<512xf32> to vector<1x512xf32>
    %133 = vector.broadcast %132 : vector<1x512xf32> to vector<8x512xf32>
    %134 = arith.mulf %129, %133 : vector<8x512xf32>
    %c24_41 = arith.constant 24 : index
    %c0_42 = arith.constant 0 : index
    %135 = vector.load %arg7[%c24_41, %c0_42] : memref<144x512xf32, #tpu.memory_space<vmem>>, vector<8x512xf32>
    tpu.vector_store %arg7[%c24_41, %c0_42], %134 {strides = array<i32>} : memref<144x512xf32, #tpu.memory_space<vmem>>, vector<8x512xf32>,
    %c32_43 = arith.constant 32 : index
    %c0_44 = arith.constant 0 : index
    %136 = vector.load %arg7[%c32_43, %c0_44] : memref<144x512xf32, #tpu.memory_space<vmem>>, vector<8x512xf32>
    tpu.vector_store %arg7[%c32_43, %c0_44], %107 {strides = array<i32>} : memref<144x512xf32, #tpu.memory_space<vmem>>, vector<8x512xf32>,
    %c511_i32_45 = arith.constant 511 : i32
    %137 = tpu.dynamic_rotate %107 by %c511_i32_45 dim 1 : vector<8x512xf32>, i32 -> vector<8x512xf32>
    %138 = vector.extract_strided_slice %3 {offsets = [5, 0], sizes = [1, 512], strides = [1, 1]} : vector<9x512xf32> to vector<1x512xf32>
    %139 = vector.shape_cast %138 : vector<1x512xf32> to vector<512xf32>
    %140 = vector.shape_cast %139 : vector<512xf32> to vector<1x512xf32>
    %141 = vector.broadcast %140 : vector<1x512xf32> to vector<8x512xf32>
    %142 = arith.mulf %137, %141 : vector<8x512xf32>
    %c40_46 = arith.constant 40 : index
    %c0_47 = arith.constant 0 : index
    %143 = vector.load %arg7[%c40_46, %c0_47] : memref<144x512xf32, #tpu.memory_space<vmem>>, vector<8x512xf32>
    tpu.vector_store %arg7[%c40_46, %c0_47], %142 {strides = array<i32>} : memref<144x512xf32, #tpu.memory_space<vmem>>, vector<8x512xf32>,
    %c497_i32_48 = arith.constant 497 : i32
    %144 = tpu.dynamic_rotate %107 by %c497_i32_48 dim 1 : vector<8x512xf32>, i32 -> vector<8x512xf32>
    %145 = vector.extract_strided_slice %3 {offsets = [6, 0], sizes = [1, 512], strides = [1, 1]} : vector<9x512xf32> to vector<1x512xf32>
    %146 = vector.shape_cast %145 : vector<1x512xf32> to vector<512xf32>
    %147 = vector.shape_cast %146 : vector<512xf32> to vector<1x512xf32>
    %148 = vector.broadcast %147 : vector<1x512xf32> to vector<8x512xf32>
    %149 = arith.mulf %144, %148 : vector<8x512xf32>
    %c48_49 = arith.constant 48 : index
    %c0_50 = arith.constant 0 : index
    %150 = vector.load %arg7[%c48_49, %c0_50] : memref<144x512xf32, #tpu.memory_space<vmem>>, vector<8x512xf32>
    tpu.vector_store %arg7[%c48_49, %c0_50], %149 {strides = array<i32>} : memref<144x512xf32, #tpu.memory_space<vmem>>, vector<8x512xf32>,
    %c496_i32_51 = arith.constant 496 : i32
    %151 = tpu.dynamic_rotate %107 by %c496_i32_51 dim 1 : vector<8x512xf32>, i32 -> vector<8x512xf32>
    %152 = vector.extract_strided_slice %3 {offsets = [7, 0], sizes = [1, 512], strides = [1, 1]} : vector<9x512xf32> to vector<1x512xf32>
    %153 = vector.shape_cast %152 : vector<1x512xf32> to vector<512xf32>
    %154 = vector.shape_cast %153 : vector<512xf32> to vector<1x512xf32>
    %155 = vector.broadcast %154 : vector<1x512xf32> to vector<8x512xf32>
    %156 = arith.mulf %151, %155 : vector<8x512xf32>
    %c56_52 = arith.constant 56 : index
    %c0_53 = arith.constant 0 : index
    %157 = vector.load %arg7[%c56_52, %c0_53] : memref<144x512xf32, #tpu.memory_space<vmem>>, vector<8x512xf32>
    tpu.vector_store %arg7[%c56_52, %c0_53], %156 {strides = array<i32>} : memref<144x512xf32, #tpu.memory_space<vmem>>, vector<8x512xf32>,
    %c495_i32_54 = arith.constant 495 : i32
    %158 = tpu.dynamic_rotate %107 by %c495_i32_54 dim 1 : vector<8x512xf32>, i32 -> vector<8x512xf32>
    %159 = vector.extract_strided_slice %3 {offsets = [8, 0], sizes = [1, 512], strides = [1, 1]} : vector<9x512xf32> to vector<1x512xf32>
    %160 = vector.shape_cast %159 : vector<1x512xf32> to vector<512xf32>
    %161 = vector.shape_cast %160 : vector<512xf32> to vector<1x512xf32>
    %162 = vector.broadcast %161 : vector<1x512xf32> to vector<8x512xf32>
    %163 = arith.mulf %158, %162 : vector<8x512xf32>
    %c64_55 = arith.constant 64 : index
    %c0_56 = arith.constant 0 : index
    %164 = vector.load %arg7[%c64_55, %c0_56] : memref<144x512xf32, #tpu.memory_space<vmem>>, vector<8x512xf32>
    tpu.vector_store %arg7[%c64_55, %c0_56], %163 {strides = array<i32>} : memref<144x512xf32, #tpu.memory_space<vmem>>, vector<8x512xf32>,
    %c0_57 = arith.constant 0 : index
    %c0_58 = arith.constant 0 : index
    %165 = vector.load %arg4[%c0_57, %c0_58] : memref<8x72xf32, #tpu.memory_space<vmem>>, vector<8x72xf32>
    %c0_59 = arith.constant 0 : index
    %c0_60 = arith.constant 0 : index
    %166 = vector.load %arg7[%c0_59, %c0_60] : memref<144x512xf32, #tpu.memory_space<vmem>>, vector<72x512xf32>
    %cst_61 = arith.constant dense<0.000000e+00> : vector<8x512xf32>
    %167 = tpu.matmul %165, %166, %cst_61 {dimension_numbers = #tpu.dot_dimension_numbers<[1], [0], [0], [1], [0, 0, 1, 1], [], []>} : vector<8x72xf32>, vector<72x512xf32>, vector<8x512xf32> -> vector<8x512xf32>
    %168 = arith.addf %167, %106 : vector<8x512xf32>
    %169 = math.tanh %168 : vector<8x512xf32>
    %cst_62 = arith.constant 1.000000e+00 : f32
    %170 = vector.broadcast %cst_62 : f32 to vector<8x512xf32>
    %171 = arith.subf %170, %99 : vector<8x512xf32>
    %172 = arith.mulf %171, %2 : vector<8x512xf32>
    %173 = arith.mulf %99, %169 : vector<8x512xf32>
    %174 = arith.addf %172, %173 : vector<8x512xf32>
    %c0_63 = arith.constant 0 : index
    %c0_64 = arith.constant 0 : index
    %c0_65 = arith.constant 0 : index
    %175 = vector.load %arg6[%c0_63, %c0_64, %c0_65] : memref<1x8x512xf32, #tpu.memory_space<vmem>>, vector<1x8x512xf32>
    %176 = vector.shape_cast %175 : vector<1x8x512xf32> to vector<8x512xf32>
    %177 = vector.shape_cast %174 : vector<8x512xf32> to vector<1x8x512xf32>
    tpu.vector_store %arg6[%c0_63, %c0_64, %c0_65], %177 {strides = array<i32>} : memref<1x8x512xf32, #tpu.memory_space<vmem>>, vector<1x8x512xf32>,
    return
  }
  func.func @transform_0(%arg0: i32) -> (i32, i32, i32) {
    %c0_i32 = arith.constant 0 : i32
    %c0_i32_0 = arith.constant 0 : i32
    %c0_i32_1 = arith.constant 0 : i32
    return %arg0, %c0_i32, %c0_i32_0 : i32, i32, i32
  }
  func.func @transform_1(%arg0: i32) -> (i32, i32) {
    %c0_i32 = arith.constant 0 : i32
    %c0_i32_0 = arith.constant 0 : i32
    %c0_i32_1 = arith.constant 0 : i32
    return %c0_i32, %c0_i32_0 : i32, i32
  }
  func.func @transform_2(%arg0: i32) -> (i32, i32) {
    %c0_i32 = arith.constant 0 : i32
    %c0_i32_0 = arith.constant 0 : i32
    %c0_i32_1 = arith.constant 0 : i32
    return %c0_i32, %c0_i32_0 : i32, i32
  }
  func.func @transform_3(%arg0: i32) -> (i32, i32) {
    %c0_i32 = arith.constant 0 : i32
    %c0_i32_0 = arith.constant 0 : i32
    %c0_i32_1 = arith.constant 0 : i32
    return %c0_i32, %c0_i32_0 : i32, i32
  }
  func.func @transform_4(%arg0: i32) -> (i32, i32) {
    %c0_i32 = arith.constant 0 : i32
    %c0_i32_0 = arith.constant 0 : i32
    %c0_i32_1 = arith.constant 0 : i32
    return %c0_i32, %c0_i32_0 : i32, i32
  }
  func.func @transform_5(%arg0: i32) -> (i32, i32, i32) {
    %c0_i32 = arith.constant 0 : i32
    %c0_i32_0 = arith.constant 0 : i32
    %c0_i32_1 = arith.constant 0 : i32
    return %arg0, %c0_i32, %c0_i32_0 : i32, i32, i32
  }
}

</mosaic_0001>

<bundles_post_ra>
// kernel: conv_gru_pallas.1
= control target key start
LH: loop header
LB: loop body
LE: loop exit
PB: predicated region body
PF: predicated region fallthrough
CT: control target
= control target key end

     0   :  { %s1277_s22 = smov 113   ;;  %s1278_s27 = smov 127   ;;  %v52_v8 = vlaneseq  ;;  %vm598_vm0 = vcmask 130048   ;;  %v1285_v34 = vmov 0   ;;  %vm1027_vm9 = vcmask 588800   ;;  %s2076_s0 = inlined_call_operand.vmem [shape: f32[1,16,512], index: 0, kind: input, shape index: {}]   ;;  %s2077_s1 = inlined_call_operand.vmem [shape: f32[9,512], index: 1, kind: input, shape index: {}]   ;;  %s2078_s2 = inlined_call_operand.vmem [shape: f32[24,144], index: 2, kind: input, shape index: {}]   ;;  %s2079_s4 = inlined_call_operand.vmem [shape: f32[24,1], index: 4, kind: input, shape index: {}]   ;;  %s2080_s3 = inlined_call_operand.vmem [shape: f32[8,72], index: 3, kind: input, shape index: {}]   ;;  %s2081_s5 = inlined_call_operand.vmem [shape: f32[1,8,512], index: 5, kind: output, shape index: {}]  }
   0x1   :  { %v1320_v0 = vld [vmem:[%s2076_s0 + $0x30] sm:$0xff]  ;;  %v1325_v1 = vld [vmem:[%s2076_s0 + $0x20] sm:$0xff]  ;;  %v1334_v2 = vld [vmem:[%s2076_s0 + $0x38] sm:$0xff]  ;;  %s1279_s28 = smov 1   ;;  %s1280_s29 = smov 15   ;;  %1231 = vset.pattern.permute.xlu0 %v1285_v34  ;;  %1232 = vset.pattern.permute.xlu1 %v1285_v34 }
   0x2   :  { %341 = vrot.lane.b32.xlu1 %v1320_v0, %s1277_s22  ;;  %333 = vrot.lane.b32.xlu0 %v1325_v1, %s1277_s22  ;;  %v1339_v3 = vld [vmem:[%s2076_s0 + $0x28] sm:$0xff]  ;;  %s1281_s30 = smov 16   ;;  %s1282_s6 = smov 17   ;;  %v1393_v5 = vld [vmem:[%s2076_s0] sm:$0xff]  ;;  %v1469_v9 = vshrl.u32 %v52_v8, 7  ;;  %v1475_v10 = vand.u32 127, %v52_v8 }
   0x3   :  { %v1388_v4 = vld [vmem:[%s2076_s0 + $0x8] sm:$0xff]  ;;  %s1283_s11 = smov 111   ;;  %v1402_v6 = vld [vmem:[%s2076_s0 + $0x18] sm:$0xff]  ;;  %v1407_v7 = vld [vmem:[%s2076_s0 + $0x10] sm:$0xff]  ;;  %s1284_s16 = smov 112  }
   0x4   :  { %v358_v11 = vsub.s32 6, %v1469_v9  ;;  %v1481_v12 = vld [vmem:[%s2077_s1 + $0x8] sm:$0xff]  ;;  %v1486_v13 = vld [vmem:[%s2077_s1 + $0x18] sm:$0xff]  ;;  %v1491_v14 = vld [vmem:[%s2077_s1] sm:$0xff]  ;;  %vm347_vm1 = vcmp.lt.s32.totalorder %v1475_v10, 113  ;;  %v301_v32 = vsub.s32 5, %v1469_v9 }
   0x5   :  { %v1496_v17 = vld [vmem:[%s2077_s1 + $0x10] sm:$0xff]  ;;  %v503_v18 = vld [vmem:[%s2078_s2 + $0x8] sm:$0xff]  ;;  %vm290_vm2 = vcmp.lt.s32.totalorder %v1475_v10, 127  ;;  %v236_v40 = vsub.s32 3, %v1469_v9  ;;  %vm225_vm3 = vcmp.lt.s32.totalorder %v1475_v10, 1  ;;  %v179_v61 = vsub.s32 2, %v1469_v9 }
   0x6   :  { %345 = vrot.lane.b32.xlu1 %v1334_v2, %s1277_s22  ;;  %337 = vrot.lane.b32.xlu0 %v1339_v3, %s1277_s22  ;;  %v1507_v19 = vrot.slane %v1481_v12, %v358_v11  ;;  %v1510_v20 = vrot.slane %v1486_v13, %v358_v11  ;;  %v1513_v21 = vrot.slane %v1491_v14, %v358_v11  ;;  %v581_v42 = vld [vmem:[%s2079_s4 + $0x8] sm:$0xff]  ;;  %vm168_vm4 = vcmp.lt.s32.totalorder %v1475_v10, 15 }
   0x7   :  { %v1516_v22 = vrot.slane %v1496_v17, %v358_v11  ;;  %1205 = vmatprep.mubr.msk.f32.mxu0 %vm598_vm0, %v503_v18  ;;  %1208 = vmatprep.mubr.msk.f32.mxu1 %vm598_vm0, %v503_v18  ;;  %v1543_v37 = vrot.slane %v1486_v13, %v301_v32  ;;  %v1546_v38 = vrot.slane %v1481_v12, %v301_v32  ;;  %vm111_vm5 = vcmp.lt.s32.totalorder %v1475_v10, 16 }
   0x8   :  { %v1549_v39 = vrot.slane %v1496_v17, %v301_v32  ;;  %v1553_v41 = vrot.slane %v1491_v14, %v301_v32  ;;  %v1571_v52 = vrot.slane %v1481_v12, %v236_v40  ;;  %v1577_v57 = vrot.slane %v1491_v14, %v236_v40 }
   0x9   :  { %v1582_v59 = vrot.slane %v1496_v17, %v236_v40  ;;  %v1585_v60 = vrot.slane %v1486_v13, %v236_v40  ;;  %vm54_vm6 = vcmp.lt.s32.totalorder %v1475_v10, 17  ;;  %vm461_vm7 = vcmp.lt.s32.totalorder %v1475_v10, 111 }
   0xa   :  { %280 = vrot.lane.b32.xlu1 %v1339_v3, %s1278_s27  ;;  %276 = vrot.lane.b32.xlu0 %v1325_v1, %s1278_s27  ;;  %vm404_vm8 = vcmp.lt.s32.totalorder %v1475_v10, 112 }
   0xe   :  { %288 = vrot.lane.b32.xlu1 %v1334_v2, %s1278_s27  ;;  %284 = vrot.lane.b32.xlu0 %v1320_v0, %s1278_s27 }
  0x12   :  { %215 = vrot.lane.b32.xlu1 %v1339_v3, %s1279_s28  ;;  %211 = vrot.lane.b32.xlu0 %v1325_v1, %s1279_s28 }
  0x16   :  { %223 = vrot.lane.b32.xlu1 %v1334_v2, %s1279_s28  ;;  %219 = vrot.lane.b32.xlu0 %v1320_v0, %s1279_s28 }
  0x1a   :  { %158 = vrot.lane.b32.xlu1 %v1339_v3, %s1280_s29  ;;  %154 = vrot.lane.b32.xlu0 %v1325_v1, %s1280_s29 }
  0x1e   :  { %166 = vrot.lane.b32.xlu1 %v1334_v2, %s1280_s29  ;;  %162 = vrot.lane.b32.xlu0 %v1320_v0, %s1280_s29 }
  0x22   :  { %101 = vrot.lane.b32.xlu1 %v1339_v3, %s1281_s30  ;;  %97 = vrot.lane.b32.xlu0 %v1325_v1, %s1281_s30 }
  0x26   :  { %109 = vrot.lane.b32.xlu1 %v1334_v2, %s1281_s30  ;;  %105 = vrot.lane.b32.xlu0 %v1320_v0, %s1281_s30 }
  0x2a   :  { %42 = vrot.lane.b32.xlu1 %v1339_v3, %s1282_s6  ;;  %38 = vrot.lane.b32.xlu0 %v1325_v1, %s1282_s6 }
  0x2e   :  { %50 = vrot.lane.b32.xlu1 %v1334_v2, %s1282_s6  ;;  %46 = vrot.lane.b32.xlu0 %v1320_v0, %s1282_s6 }
  0x32   :  { %449 = vrot.lane.b32.xlu1 %v1388_v4, %s1283_s11  ;;  %445 = vrot.lane.b32.xlu0 %v1393_v5, %s1283_s11 }
  0x36   :  { %457 = vrot.lane.b32.xlu1 %v1402_v6, %s1283_s11  ;;  %453 = vrot.lane.b32.xlu0 %v1407_v7, %s1283_s11 }
  0x3a   :  { %392 = vrot.lane.b32.xlu1 %v1388_v4, %s1284_s16  ;;  %388 = vrot.lane.b32.xlu0 %v1393_v5, %s1284_s16 }
  0x3e   :  { %400 = vrot.lane.b32.xlu1 %v1402_v6, %s1284_s16  ;;  %396 = vrot.lane.b32.xlu0 %v1407_v7, %s1284_s16 }
  0x42   :  { %335 = vrot.lane.b32.xlu1 %v1388_v4, %s1277_s22  ;;  %331 = vrot.lane.b32.xlu0 %v1393_v5, %s1277_s22 }
  0x46   :  { %343 = vrot.lane.b32.xlu1 %v1402_v6, %s1277_s22  ;;  %339 = vrot.lane.b32.xlu0 %v1407_v7, %s1277_s22 }
  0x4a   :  { %278 = vrot.lane.b32.xlu1 %v1388_v4, %s1278_s27  ;;  %274 = vrot.lane.b32.xlu0 %v1393_v5, %s1278_s27 }
  0x4e   :  { %286 = vrot.lane.b32.xlu1 %v1402_v6, %s1278_s27  ;;  %282 = vrot.lane.b32.xlu0 %v1407_v7, %s1278_s27 }
  0x52   :  { %213 = vrot.lane.b32.xlu1 %v1388_v4, %s1279_s28  ;;  %209 = vrot.lane.b32.xlu0 %v1393_v5, %s1279_s28 }
  0x56   :  { %221 = vrot.lane.b32.xlu1 %v1402_v6, %s1279_s28  ;;  %217 = vrot.lane.b32.xlu0 %v1407_v7, %s1279_s28 }
  0x5a   :  { %156 = vrot.lane.b32.xlu1 %v1388_v4, %s1280_s29  ;;  %152 = vrot.lane.b32.xlu0 %v1393_v5, %s1280_s29 }
  0x5e   :  { %164 = vrot.lane.b32.xlu1 %v1402_v6, %s1280_s29  ;;  %160 = vrot.lane.b32.xlu0 %v1407_v7, %s1280_s29 }
  0x62   :  { %99 = vrot.lane.b32.xlu1 %v1388_v4, %s1281_s30  ;;  %95 = vrot.lane.b32.xlu0 %v1393_v5, %s1281_s30 }
  0x66   :  { %107 = vrot.lane.b32.xlu1 %v1402_v6, %s1281_s30  ;;  %103 = vrot.lane.b32.xlu0 %v1407_v7, %s1281_s30 }
  0x6a   :  { %40 = vrot.lane.b32.xlu1 %v1388_v4, %s1282_s6  ;;  %36 = vrot.lane.b32.xlu0 %v1393_v5, %s1282_s6 }
  0x6e   :  { %48 = vrot.lane.b32.xlu1 %v1402_v6, %s1282_s6  ;;  %44 = vrot.lane.b32.xlu0 %v1407_v7, %s1282_s6 }
  0x72   :  { %451 = vrot.lane.b32.xlu1 %v1339_v3, %s1283_s11  ;;  %447 = vrot.lane.b32.xlu0 %v1325_v1, %s1283_s11 }
  0x74   :  { %v342_v15 = vpop.permute.xlu1 %341  ;;  %v334_v16 = vpop.permute.xlu0 %333 }
  0x76   :  { %459 = vrot.lane.b32.xlu1 %v1334_v2, %s1283_s11  ;;  %455 = vrot.lane.b32.xlu0 %v1320_v0, %s1283_s11 }
  0x78   :  { %v346_v23 = vpop.permute.xlu1 %345  ;;  %v338_v24 = vpop.permute.xlu0 %337 }
  0x79   :  { %v349_v25 = vsel %vm347_vm1, %v342_v15, %v346_v23  ;;  %v353_v26 = vsel %vm347_vm1, %v334_v16, %v338_v24  ;;  %v351_v27 = vsel %vm347_vm1, %v338_v24, %v342_v15  ;;  %v355_v28 = vsel %vm347_vm1, %v346_v23, %v334_v16 }
  0x7a   :  { %394 = vrot.lane.b32.xlu1 %v1339_v3, %s1284_s16  ;;  %390 = vrot.lane.b32.xlu0 %v1325_v1, %s1284_s16  ;;  %v377_v29 = vmul.f32 %v1507_v19, %v351_v27  ;;  %v379_v30 = vmul.f32 %v1510_v20, %v355_v28  ;;  %v376_v31 = vmul.f32 %v1513_v21, %v353_v26  ;;  %v122_v28 = vsub.s32 1, %v1469_v9 }
  0x7b   :  { %v378_v33 = vmul.f32 %v1516_v22, %v349_v25  ;;  %v1602_v15 = vrot.slane %v1481_v12, %v179_v61  ;;  %v1607_v24 = vrot.slane %v1491_v14, %v179_v61  ;;  %v1611_v26 = vrot.slane %v1496_v17, %v179_v61 }
  0x7c   :  { %v281_v35 = vpop.permute.xlu1 %280  ;;  %608 = vmatprep.subr.mxu0 %v377_v29  ;;  %691 = vmatprep.subr.mxu1 %v379_v30  ;;  %v277_v36 = vpop.permute.xlu0 %276  ;;  %v1614_v27 = vrot.slane %v1486_v13, %v179_v61  ;;  %v1628_v40 = vrot.slane %v1481_v12, %v122_v28 }
  0x7d   :  { %609 = vmatpush1.msra.mxu0 %v376_v31  ;;  %692 = vmatpush1.msra.mxu1 %v378_v33  ;;  %v296_v43 = vsel %vm290_vm2, %v277_v36, %v281_v35 }
  0x7e   :  { %402 = vrot.lane.b32.xlu1 %v1334_v2, %s1284_s16  ;;  %398 = vrot.lane.b32.xlu0 %v1320_v0, %s1284_s16  ;;  %v319_v53 = vmul.f32 %v1553_v41, %v296_v43 }
  0x80   :  { %v289_v44 = vpop.permute.xlu1 %288  ;;  %v285_v45 = vpop.permute.xlu0 %284 }
  0x81   :  { %v298_v46 = vsel %vm290_vm2, %v289_v44, %v277_v36  ;;  %v292_v47 = vsel %vm290_vm2, %v285_v45, %v289_v44  ;;  %v294_v48 = vsel %vm290_vm2, %v281_v35, %v285_v45  ;;  %v1633_v45 = vrot.slane %v1491_v14, %v122_v28 }
  0x82   :  { %v322_v49 = vmul.f32 %v1543_v37, %v298_v46  ;;  %v320_v50 = vmul.f32 %v1546_v38, %v294_v48  ;;  %v321_v51 = vmul.f32 %v1549_v39, %v292_v47  ;;  %590 = vperm.xlu0 %1231, %v581_v42   ;;  %v1637_v47 = vrot.slane %v1496_v17, %v122_v28 }
  0x83   :  { %v1640_v48 = vrot.slane %v1486_v13, %v122_v28 }
  0x84   :  { %v216_v54 = vpop.permute.xlu1 %215  ;;  %610 = vmatprep.subr.mxu0 %v320_v50  ;;  %693 = vmatprep.subr.mxu1 %v322_v49  ;;  %v212_v55 = vpop.permute.xlu0 %211  ;;  %v65_v49 = vsub.s32 0, %v1469_v9 }
  0x85   :  { %v231_v56 = vsel %vm225_vm3, %v212_v55, %v216_v54  ;;  %611 = vmatpush1.msra.mxu0 %v319_v53  ;;  %694 = vmatpush1.msra.mxu1 %v321_v51 }
  0x86   :  { %v255_v58 = vmul.f32 %v1571_v52, %v231_v56  ;;  %612 = vmatprep.subr.mxu0 %v1339_v3  ;;  %695 = vmatprep.subr.mxu1 %v1334_v2 }
  0x87   :  { %613 = vmatpush1.msra.mxu0 %v1325_v1  ;;  %696 = vmatpush1.msra.mxu1 %v1320_v0 }
  0x88   :  { %v224_v62 = vpop.permute.xlu1 %223  ;;  %614 = vmatprep.subr.mxu0 %v255_v58  ;;  %v220_v63 = vpop.permute.xlu0 %219 }
  0x89   :  { %v233_v3 = vsel %vm225_vm3, %v224_v62, %v212_v55  ;;  %v227_v8 = vsel %vm225_vm3, %v220_v63, %v224_v62  ;;  %v229_v11 = vsel %vm225_vm3, %v216_v54, %v220_v63  ;;  %v1654_v62 = vrot.slane %v1481_v12, %v65_v49 }
  0x8a   :  { %v254_v2 = vmul.f32 %v1577_v57, %v233_v3  ;;  %v256_v1 = vmul.f32 %v1582_v59, %v229_v11  ;;  %v257_v0 = vmul.f32 %v1585_v60, %v227_v8 }
  0x8c   :  { %v159_v16 = vpop.permute.xlu1 %158  ;;  %615 = vmatpush1.msra.mxu0 %v254_v2  ;;  %697 = vmatprep.subr.mxu1 %v257_v0  ;;  %v155_v18 = vpop.permute.xlu0 %154  ;;  %v1660_v2 = vrot.slane %v1491_v14, %v65_v49  ;;  %v1666_v0 = vrot.slane %v1486_v13, %v65_v49 }
  0x8d   :  { %v174_v23 = vsel %vm168_vm4, %v155_v18, %v159_v16  ;;  %698 = vmatpush1.msra.mxu1 %v256_v1  ;;  %v1663_v1 = vrot.slane %v1496_v17, %v65_v49 }
  0x8e   :  { %v198_v25 = vmul.f32 %v1602_v15, %v174_v23 }
  0x90   :  { %v167_v29 = vpop.permute.xlu1 %166  ;;  %616 = vmatprep.subr.mxu0 %v198_v25  ;;  %v163_v30 = vpop.permute.xlu0 %162 }
  0x91   :  { %v176_v31 = vsel %vm168_vm4, %v167_v29, %v155_v18  ;;  %v170_v32 = vsel %vm168_vm4, %v163_v30, %v167_v29  ;;  %v172_v33 = vsel %vm168_vm4, %v159_v16, %v163_v30 }
  0x92   :  { %v197_v34 = vmul.f32 %v1607_v24, %v176_v31  ;;  %v199_v35 = vmul.f32 %v1611_v26, %v172_v33  ;;  %v200_v36 = vmul.f32 %v1614_v27, %v170_v32 }
  0x94   :  { %v102_v42 = vpop.permute.xlu1 %101  ;;  %617 = vmatpush1.msra.mxu0 %v197_v34  ;;  %699 = vmatprep.subr.mxu1 %v200_v36  ;;  %v98_v43 = vpop.permute.xlu0 %97  ;;  %v1681_v34 = vld [vmem:[%s2077_s1 + $0x38] ss:$0 sm:$0xff]  ;;  %v1691_v36 = vld [vmem:[%s2077_s1 + $0x30] ss:$0 sm:$0xff] }
  0x95   :  { %v117_v44 = vsel %vm111_vm5, %v98_v43, %v102_v42  ;;  %700 = vmatpush1.msra.mxu1 %v199_v35  ;;  %v1686_v35 = vld [vmem:[%s2077_s1 + $0x28] ss:$0 sm:$0xff] }
  0x96   :  { %v141_v46 = vmul.f32 %v1628_v40, %v117_v44 }
  0x98   :  { %v110_v50 = vpop.permute.xlu1 %109  ;;  %618 = vmatprep.subr.mxu0 %v141_v46  ;;  %v106_v51 = vpop.permute.xlu0 %105 }
  0x99   :  { %v119_v53 = vsel %vm111_vm5, %v110_v50, %v98_v43  ;;  %v113_v54 = vsel %vm111_vm5, %v106_v51, %v110_v50  ;;  %v115_v55 = vsel %vm111_vm5, %v102_v42, %v106_v51  ;;  %v1696_v42 = vld [vmem:[%s2077_s1 + $0x20] ss:$0 sm:$0xff] }
  0x9a   :  { %v140_v56 = vmul.f32 %v1633_v45, %v119_v53  ;;  %v142_v58 = vmul.f32 %v1637_v47, %v115_v55  ;;  %v143_v61 = vmul.f32 %v1640_v48, %v113_v54 }
  0x9c   :  { %v43_v63 = vpop.permute.xlu1 %42  ;;  %619 = vmatpush1.msra.mxu0 %v140_v56  ;;  %701 = vmatprep.subr.mxu1 %v143_v61  ;;  %v39_v3 = vpop.permute.xlu0 %38 }
  0x9d   :  { %v60_v8 = vsel %vm54_vm6, %v39_v3, %v43_v63  ;;  %702 = vmatpush1.msra.mxu1 %v142_v58  ;;  %v415_v58 = vsub.s32 7, %v1469_v9 }
  0x9e   :  { %v84_v11 = vmul.f32 %v1654_v62, %v60_v8 }
  0x9f   :  { %v1716_v8 = vrot.slane %v1481_v12, %v415_v58 }
  0xa0   :  { %v51_v16 = vpop.permute.xlu1 %50  ;;  %620 = vmatprep.subr.mxu0 %v84_v11  ;;  %v47_v18 = vpop.permute.xlu0 %46  ;;  %v1719_v11 = vrot.slane %v1496_v17, %v415_v58 }
  0xa1   :  { %v62_v23 = vsel %vm54_vm6, %v51_v16, %v39_v3  ;;  %v56_v25 = vsel %vm54_vm6, %v47_v18, %v51_v16  ;;  %v58_v28 = vsel %vm54_vm6, %v43_v63, %v47_v18  ;;  %v1713_v3 = vrot.slane %v1486_v13, %v415_v58 }
  0xa2   :  { %v83_v29 = vmul.f32 %v1660_v2, %v62_v23  ;;  %v85_v30 = vmul.f32 %v1663_v1, %v58_v28  ;;  %v86_v31 = vmul.f32 %v1666_v0, %v56_v25  ;;  %v1722_v16 = vrot.slane %v1491_v14, %v415_v58 }
  0xa4   :  { %621 = vmatpush1.msra.mxu0 %v83_v29  ;;  %703 = vmatprep.subr.mxu1 %v86_v31  ;;  %v450_v32 = vpop.permute.xlu1 %449  ;;  %v446_v33 = vpop.permute.xlu0 %445 }
  0xa5   :  { %704 = vmatpush1.msra.mxu1 %v85_v30  ;;  %v466_v43 = vsel %vm461_vm7, %v446_v33, %v450_v32 }
  0xa6   :  { %v486_v56 = vmul.f32 %v1696_v42, %v466_v43 }
  0xa8   :  { %v458_v44 = vpop.permute.xlu1 %457  ;;  %v454_v46 = vpop.permute.xlu0 %453 }
  0xa9   :  { %v468_v49 = vsel %vm461_vm7, %v458_v44, %v446_v33  ;;  %v462_v50 = vsel %vm461_vm7, %v454_v46, %v458_v44  ;;  %v464_v51 = vsel %vm461_vm7, %v450_v32, %v454_v46 }
  0xaa   :  { %v489_v53 = vmul.f32 %v1681_v34, %v468_v49  ;;  %v487_v54 = vmul.f32 %v1686_v35, %v464_v51  ;;  %v488_v55 = vmul.f32 %v1691_v36, %v462_v50 }
  0xac   :  { %v393_v61 = vpop.permute.xlu1 %392  ;;  %622 = vmatprep.subr.mxu0 %v487_v54  ;;  %705 = vmatprep.subr.mxu1 %v489_v53  ;;  %v389_v63 = vpop.permute.xlu0 %388 }
  0xad   :  { %623 = vmatpush1.msra.mxu0 %v486_v56  ;;  %706 = vmatpush1.msra.mxu1 %v488_v55  ;;  %v409_v9 = vsel %vm404_vm8, %v389_v63, %v393_v61 }
  0xae   :  { %v429_v29 = vmul.f32 %v1722_v16, %v409_v9 }
  0xb0   :  { %v401_v18 = vpop.permute.xlu1 %400  ;;  %v397_v23 = vpop.permute.xlu0 %396 }
  0xb1   :  { %v411_v25 = vsel %vm404_vm8, %v401_v18, %v389_v63  ;;  %v405_v13 = vsel %vm404_vm8, %v397_v23, %v401_v18  ;;  %v407_v12 = vsel %vm404_vm8, %v393_v61, %v397_v23 }
  0xb2   :  { %v432_v17 = vmul.f32 %v1713_v3, %v411_v25  ;;  %v430_v28 = vmul.f32 %v1716_v8, %v407_v12  ;;  %v431_v14 = vmul.f32 %v1719_v11, %v405_v13 }
  0xb4   :  { %v336_v30 = vpop.permute.xlu1 %335  ;;  %624 = vmatprep.subr.mxu0 %v430_v28  ;;  %707 = vmatprep.subr.mxu1 %v432_v17  ;;  %v332_v31 = vpop.permute.xlu0 %331 }
  0xb5   :  { %625 = vmatpush1.msra.mxu0 %v429_v29  ;;  %708 = vmatpush1.msra.mxu1 %v431_v14  ;;  %v352_v32 = vsel %vm347_vm1, %v332_v31, %v336_v30 }
  0xb6   :  { %v372_v54 = vmul.f32 %v1513_v21, %v352_v32 }
  0xb8   :  { %v344_v33 = vpop.permute.xlu1 %343  ;;  %v340_v43 = vpop.permute.xlu0 %339 }
  0xb9   :  { %v354_v44 = vsel %vm347_vm1, %v344_v33, %v332_v31  ;;  %v348_v46 = vsel %vm347_vm1, %v340_v43, %v344_v33  ;;  %v350_v49 = vsel %vm347_vm1, %v336_v30, %v340_v43 }
  0xba   :  { %v375_v50 = vmul.f32 %v1510_v20, %v354_v44  ;;  %v373_v51 = vmul.f32 %v1507_v19, %v350_v49  ;;  %v374_v53 = vmul.f32 %v1516_v22, %v348_v46 }
  0xbc   :  { %v279_v55 = vpop.permute.xlu1 %278  ;;  %626 = vmatprep.subr.mxu0 %v373_v51  ;;  %709 = vmatprep.subr.mxu1 %v375_v50  ;;  %v275_v56 = vpop.permute.xlu0 %274 }
  0xbd   :  { %627 = vmatpush1.msra.mxu0 %v372_v54  ;;  %710 = vmatpush1.msra.mxu1 %v374_v53  ;;  %v295_v58 = vsel %vm290_vm2, %v275_v56, %v279_v55 }
  0xbe   :  { %v315_v17 = vmul.f32 %v1553_v41, %v295_v58 }
  0xc0   :  { %v287_v61 = vpop.permute.xlu1 %286  ;;  %v283_v63 = vpop.permute.xlu0 %282 }
  0xc1   :  { %v297_v9 = vsel %vm290_vm2, %v287_v61, %v275_v56  ;;  %v291_v18 = vsel %vm290_vm2, %v283_v63, %v287_v61  ;;  %v293_v23 = vsel %vm290_vm2, %v279_v55, %v283_v63 }
  0xc2   :  { %v318_v25 = vmul.f32 %v1543_v37, %v297_v9  ;;  %v316_v13 = vmul.f32 %v1546_v38, %v293_v23  ;;  %v317_v12 = vmul.f32 %v1549_v39, %v291_v18 }
  0xc4   :  { %v214_v28 = vpop.permute.xlu1 %213  ;;  %628 = vmatprep.subr.mxu0 %v316_v13  ;;  %711 = vmatprep.subr.mxu1 %v318_v25  ;;  %v210_v14 = vpop.permute.xlu0 %209 }
  0xc5   :  { %v230_v29 = vsel %vm225_vm3, %v210_v14, %v214_v28  ;;  %629 = vmatpush1.msra.mxu0 %v315_v17  ;;  %712 = vmatpush1.msra.mxu1 %v317_v12 }
  0xc6   :  { %v251_v30 = vmul.f32 %v1571_v52, %v230_v29  ;;  %630 = vmatprep.subr.mxu0 %v1388_v4  ;;  %713 = vmatprep.subr.mxu1 %v1402_v6 }
  0xc7   :  { %631 = vmatpush1.msra.mxu0 %v1393_v5  ;;  %714 = vmatpush1.msra.mxu1 %v1407_v7 }
  0xc8   :  { %v222_v31 = vpop.permute.xlu1 %221  ;;  %632 = vmatprep.subr.mxu0 %v251_v30  ;;  %v218_v32 = vpop.permute.xlu0 %217 }
  0xc9   :  { %v232_v33 = vsel %vm225_vm3, %v222_v31, %v210_v14  ;;  %v226_v43 = vsel %vm225_vm3, %v218_v32, %v222_v31  ;;  %v228_v44 = vsel %vm225_vm3, %v214_v28, %v218_v32 }
  0xca   :  { %v250_v46 = vmul.f32 %v1577_v57, %v232_v33  ;;  %v252_v49 = vmul.f32 %v1582_v59, %v228_v44  ;;  %v253_v50 = vmul.f32 %v1585_v60, %v226_v43 }
  0xcc   :  { %v157_v51 = vpop.permute.xlu1 %156  ;;  %633 = vmatpush1.msra.mxu0 %v250_v46  ;;  %715 = vmatprep.subr.mxu1 %v253_v50  ;;  %v153_v53 = vpop.permute.xlu0 %152 }
  0xcd   :  { %v173_v54 = vsel %vm168_vm4, %v153_v53, %v157_v51  ;;  %716 = vmatpush1.msra.mxu1 %v252_v49 }
  0xce   :  { %v194_v55 = vmul.f32 %v1602_v15, %v173_v54 }
  0xd0   :  { %v165_v56 = vpop.permute.xlu1 %164  ;;  %634 = vmatprep.subr.mxu0 %v194_v55  ;;  %v161_v58 = vpop.permute.xlu0 %160 }
  0xd1   :  { %v175_v61 = vsel %vm168_vm4, %v165_v56, %v153_v53  ;;  %v169_v63 = vsel %vm168_vm4, %v161_v58, %v165_v56  ;;  %v171_v9 = vsel %vm168_vm4, %v157_v51, %v161_v58 }
  0xd2   :  { %v193_v18 = vmul.f32 %v1607_v24, %v175_v61  ;;  %v195_v23 = vmul.f32 %v1611_v26, %v171_v9  ;;  %v196_v25 = vmul.f32 %v1614_v27, %v169_v63 }
  0xd4   :  { %v100_v13 = vpop.permute.xlu1 %99  ;;  %635 = vmatpush1.msra.mxu0 %v193_v18  ;;  %717 = vmatprep.subr.mxu1 %v196_v25  ;;  %v96_v12 = vpop.permute.xlu0 %95 }
  0xd5   :  { %v116_v17 = vsel %vm111_vm5, %v96_v12, %v100_v13  ;;  %718 = vmatpush1.msra.mxu1 %v195_v23 }
  0xd6   :  { %v137_v28 = vmul.f32 %v1628_v40, %v116_v17 }
  0xd8   :  { %v108_v14 = vpop.permute.xlu1 %107  ;;  %636 = vmatprep.subr.mxu0 %v137_v28  ;;  %v104_v29 = vpop.permute.xlu0 %103 }
  0xd9   :  { %v118_v30 = vsel %vm111_vm5, %v108_v14, %v96_v12  ;;  %v112_v31 = vsel %vm111_vm5, %v104_v29, %v108_v14  ;;  %v114_v32 = vsel %vm111_vm5, %v100_v13, %v104_v29 }
  0xda   :  { %v136_v33 = vmul.f32 %v1633_v45, %v118_v30  ;;  %v138_v43 = vmul.f32 %v1637_v47, %v114_v32  ;;  %v139_v44 = vmul.f32 %v1640_v48, %v112_v31 }
  0xdc   :  { %v41_v46 = vpop.permute.xlu1 %40  ;;  %637 = vmatpush1.msra.mxu0 %v136_v33  ;;  %719 = vmatprep.subr.mxu1 %v139_v44  ;;  %v37_v49 = vpop.permute.xlu0 %36 }
  0xdd   :  { %v59_v50 = vsel %vm54_vm6, %v37_v49, %v41_v46  ;;  %720 = vmatpush1.msra.mxu1 %v138_v43 }
  0xde   :  { %v80_v51 = vmul.f32 %v1654_v62, %v59_v50 }
  0xe0   :  { %v49_v53 = vpop.permute.xlu1 %48  ;;  %638 = vmatprep.subr.mxu0 %v80_v51  ;;  %v45_v54 = vpop.permute.xlu0 %44 }
  0xe1   :  { %v61_v55 = vsel %vm54_vm6, %v49_v53, %v37_v49  ;;  %v55_v56 = vsel %vm54_vm6, %v45_v54, %v49_v53  ;;  %v57_v58 = vsel %vm54_vm6, %v41_v46, %v45_v54 }
  0xe2   :  { %v79_v61 = vmul.f32 %v1660_v2, %v61_v55  ;;  %v81_v63 = vmul.f32 %v1663_v1, %v57_v58  ;;  %v82_v9 = vmul.f32 %v1666_v0, %v55_v56 }
  0xe4   :  { %v452_v18 = vpop.permute.xlu1 %451  ;;  %639 = vmatpush1.msra.mxu0 %v79_v61  ;;  %721 = vmatprep.subr.mxu1 %v82_v9  ;;  %v448_v23 = vpop.permute.xlu0 %447  ;;  %v502_v61 = vld [vmem:[%s2078_s2] sm:$0xff]  ;;  %v504_v9 = vld [vmem:[%s2078_s2 + $0x10] sm:$0xff] }
  0xe5   :  { %722 = vmatpush1.msra.mxu1 %v81_v63  ;;  %v467_v25 = vsel %vm461_vm7, %v448_v23, %v452_v18  ;;  %v505_v63 = vld [vmem:[%s2078_s2 + $0x18] sm:$0xff] }
  0xe6   :  { %v490_v32 = vmul.f32 %v1696_v42, %v467_v25 }
  0xe8   :  { %v460_v13 = vpop.permute.xlu1 %459  ;;  %v456_v12 = vpop.permute.xlu0 %455 }
  0xe9   :  { %v469_v17 = vsel %vm461_vm7, %v460_v13, %v448_v23  ;;  %v463_v28 = vsel %vm461_vm7, %v456_v12, %v460_v13  ;;  %v465_v14 = vsel %vm461_vm7, %v452_v18, %v456_v12 }
  0xea   :  { %v493_v29 = vmul.f32 %v1681_v34, %v469_v17  ;;  %v491_v30 = vmul.f32 %v1686_v35, %v465_v14  ;;  %v492_v31 = vmul.f32 %v1691_v36, %v463_v28 }
  0xec   :  { %v395_v33 = vpop.permute.xlu1 %394  ;;  %668 = vmatprep.subr.mxu0 %v491_v30  ;;  %751 = vmatprep.subr.mxu1 %v493_v29  ;;  %v391_v43 = vpop.permute.xlu0 %390 }
  0xed   :  { %669 = vmatpush2.msra.mxu0 %v490_v32  ;;  %752 = vmatpush2.msra.mxu1 %v492_v31  ;;  %v410_v44 = vsel %vm404_vm8, %v391_v43, %v395_v33 }
  0xee   :  { %v433_v58 = vmul.f32 %v1722_v16, %v410_v44 }
  0xf0   :  { %v403_v46 = vpop.permute.xlu1 %402  ;;  %v399_v49 = vpop.permute.xlu0 %398 }
  0xf1   :  { %v412_v50 = vsel %vm404_vm8, %v403_v46, %v391_v43  ;;  %v406_v51 = vsel %vm404_vm8, %v399_v49, %v403_v46  ;;  %v408_v53 = vsel %vm404_vm8, %v395_v33, %v399_v49 }
  0xf2   :  { %v436_v54 = vmul.f32 %v1713_v3, %v412_v50  ;;  %v434_v55 = vmul.f32 %v1716_v8, %v408_v53  ;;  %v435_v56 = vmul.f32 %v1719_v11, %v406_v51 }
  0xf4   :  { %670 = vmatprep.subr.mxu0 %v434_v55  ;;  %753 = vmatprep.subr.mxu1 %v436_v54 }
  0xf5   :  { %671 = vmatpush2.msra.mxu0 %v433_v58  ;;  %754 = vmatpush2.msra.mxu1 %v435_v56 }
  0xf6   :  { %673 = vmatmul.mubr.f32.vlgmr.msra.gmra.mxu0 %v502_v61  ;;  %756 = vmatmul.mubr.f32.vlgmr.msra.gmra.mxu1 %v502_v61 }
  0xf7   :  { %1206 = vmatprep.mubr.msk.f32.mxu0 %vm598_vm0, %v505_v63  ;;  %1209 = vmatprep.mubr.msk.f32.mxu1 %vm598_vm0, %v505_v63 }
  0xfa   :  { %679 = vmatmul.mubr.f32.gmra.mxu0 %v504_v9  ;;  %762 = vmatmul.mubr.f32.gmra.mxu1 %v504_v9 }
  0xfd   :  { %v591_v25 = vpop.permute.xlu0 %590 }
 0x1b6   :  { %v1847_v18 = vpop.f32.mrf.mxu0  ;;  %v1849_v23 = vpop.f32.mrf.mxu1 }
 0x1b8   :  { %v1851_v13 = vpop.f32.mrf.mxu0  ;;  %v1853_v12 = vpop.f32.mrf.mxu1 }
 0x1ba   :  { %v680_v17 = vpop.f32.mrf.mxu0  ;;  %v763_v28 = vpop.f32.mrf.mxu1 }
 0x1bb   :  { %v681_v14 = vadd.f32 %v680_v17, %v591_v25  ;;  %v764_v29 = vadd.f32 %v763_v28, %v591_v25 }
 0x1bc   :  { %v682_v30 = vpop.f32.mrf.mxu0  ;;  %v765_v31 = vpop.f32.mrf.mxu1 }
 0x1bd   :  { %v1215_v32 = vmul.f32 -1.442695, %v681_v14  ;;  %v1217_v33 = vmul.f32 -1.442695, %v764_v29  ;;  %v683_v43 = vadd.f32 %v682_v30, %v591_v25  ;;  %v766_v44 = vadd.f32 %v765_v31, %v591_v25  ;;  %v580_v30 = vld [vmem:[%s2079_s4] sm:$0xff]  ;;  %v582_v31 = vld [vmem:[%s2079_s4 + $0x10] sm:$0xff] }
 0x1bf   :  { %1233 = vpow2.f32 %v1215_v32  ;;  %v1216_v46 = vmul.f32 -1.442695, %v683_v43  ;;  %v1218_v49 = vmul.f32 -1.442695, %v766_v44 }
 0x1c0   :  { %1235 = vpow2.f32 %v1217_v33 }
 0x1c1   :  { %1237 = vpow2.f32 %v1216_v46 }
 0x1c2   :  { %1239 = vpow2.f32 %v1218_v49 }
 0x1cc   :  { %v1234_v50 = vpop.eup %1233 }
 0x1cd   :  { %v1236_v51 = vpop.eup %1235  ;;  %v810_v53 = vadd.f32 1.0, %v1234_v50 }
 0x1ce   :  { %v1238_v54 = vpop.eup %1237  ;;  %v812_v55 = vadd.f32 1.0, %v1236_v51 }
 0x1cf   :  { %v1240_v56 = vpop.eup %1239  ;;  %1241 = vrcp.f32 %v810_v53  ;;  %v811_v58 = vadd.f32 1.0, %v1238_v54 }
 0x1d0   :  { %1243 = vrcp.f32 %v812_v55  ;;  %v813_v61 = vadd.f32 1.0, %v1240_v56 }
 0x1d1   :  { %1245 = vrcp.f32 %v811_v58 }
 0x1d2   :  { %1247 = vrcp.f32 %v813_v61 }
 0x1dc   :  { %v1242_v63 = vpop.eup %1241 }
 0x1dd   :  { %v1244_v9 = vpop.eup %1243  ;;  %v1856_v25 = vmul.f32 %v1242_v63, %v1393_v5 }
 0x1de   :  { %v1246_v17 = vpop.eup %1245  ;;  %v1859_v28 = vmul.f32 %v1244_v9, %v1407_v7  ;;  %v1286_v7 = vmov 0.0  }
 0x1df   :  { %970 = vrot.lane.b32.xlu1 %v1856_v25, %s1283_s11  ;;  %v1866_v14 = vmul.f32 %v1246_v17, %v1388_v4  ;;  %v1248_v29 = vpop.eup %1247  ;;  %v507_v4 = vld [vmem:[%s2078_s2 + $0x28] sm:$0xff] }
 0x1e0   :  { %974 = vrot.lane.b32.xlu0 %v1859_v28, %s1283_s11  ;;  %v1873_v5 = vmul.f32 %v1248_v29, %v1402_v6  ;;  %v506_v6 = vld [vmem:[%s2078_s2 + $0x20] sm:$0xff]  ;;  %1207 = vmatprep.mubr.msk.f32.mxu0 %vm598_vm0, %v507_v4 }
 0x1e1   :  { %1210 = vmatprep.mubr.msk.f32.mxu1 %vm598_vm0, %v507_v4  ;;  %685 = vmatmul.mubr.f32.gmra.mxu0 %v506_v6 }
 0x1e2   :  { %768 = vmatmul.mubr.f32.gmra.mxu1 %v506_v6  ;;  %1095 = vmatprep.mubr.f32.mxu0 %v1286_v7 }
 0x1e3   :  { %972 = vrot.lane.b32.xlu1 %v1866_v14, %s1283_s11  ;;  %1166 = vmatprep.mubr.f32.mxu1 %v1286_v7 }
 0x1e4   :  { %950 = vrot.lane.b32.xlu0 %v1856_v25, %s1284_s16 }
 0x1e7   :  { %976 = vrot.lane.b32.xlu1 %v1873_v5, %s1283_s11 }
 0x1e8   :  { %954 = vrot.lane.b32.xlu0 %v1859_v28, %s1284_s16 }
 0x1eb   :  { %952 = vrot.lane.b32.xlu1 %v1866_v14, %s1284_s16 }
 0x1ec   :  { %930 = vrot.lane.b32.xlu0 %v1856_v25, %s1277_s22 }
 0x1ef   :  { %956 = vrot.lane.b32.xlu1 %v1873_v5, %s1284_s16 }
 0x1f0   :  { %934 = vrot.lane.b32.xlu0 %v1859_v28, %s1277_s22 }
 0x1f3   :  { %932 = vrot.lane.b32.xlu1 %v1866_v14, %s1277_s22 }
 0x1f4   :  { %910 = vrot.lane.b32.xlu0 %v1856_v25, %s1278_s27 }
 0x1f7   :  { %936 = vrot.lane.b32.xlu1 %v1873_v5, %s1277_s22 }
 0x1f8   :  { %914 = vrot.lane.b32.xlu0 %v1859_v28, %s1278_s27 }
 0x1fb   :  { %912 = vrot.lane.b32.xlu1 %v1866_v14, %s1278_s27 }
 0x1fc   :  { %886 = vrot.lane.b32.xlu0 %v1856_v25, %s1279_s28 }
 0x1ff   :  { %916 = vrot.lane.b32.xlu1 %v1873_v5, %s1278_s27 }
 0x200   :  { %890 = vrot.lane.b32.xlu0 %v1859_v28, %s1279_s28 }
 0x203   :  { %888 = vrot.lane.b32.xlu1 %v1866_v14, %s1279_s28 }
 0x204   :  { %866 = vrot.lane.b32.xlu0 %v1856_v25, %s1280_s29 }
 0x207   :  { %892 = vrot.lane.b32.xlu1 %v1873_v5, %s1279_s28 }
 0x208   :  { %870 = vrot.lane.b32.xlu0 %v1859_v28, %s1280_s29 }
 0x20b   :  { %868 = vrot.lane.b32.xlu1 %v1866_v14, %s1280_s29 }
 0x20c   :  { %846 = vrot.lane.b32.xlu0 %v1856_v25, %s1281_s30 }
 0x20f   :  { %872 = vrot.lane.b32.xlu1 %v1873_v5, %s1280_s29 }
 0x210   :  { %850 = vrot.lane.b32.xlu0 %v1859_v28, %s1281_s30 }
 0x213   :  { %848 = vrot.lane.b32.xlu1 %v1866_v14, %s1281_s30 }
 0x214   :  { %826 = vrot.lane.b32.xlu0 %v1856_v25, %s1282_s6 }
 0x217   :  { %852 = vrot.lane.b32.xlu1 %v1873_v5, %s1281_s30 }
 0x218   :  { %830 = vrot.lane.b32.xlu0 %v1859_v28, %s1282_s6 }
 0x21b   :  { %828 = vrot.lane.b32.xlu1 %v1866_v14, %s1282_s6 }
 0x21c   :  { %585 = vperm.xlu0 %1231, %v580_v30  }
 0x21f   :  { %832 = vrot.lane.b32.xlu1 %v1873_v5, %s1282_s6 }
 0x223   :  { %595 = vperm.xlu1 %1232, %v582_v31  }
 0x251   :  { %v971_v32 = vpop.permute.xlu1 %970 }
 0x252   :  { %v975_v33 = vpop.permute.xlu0 %974 }
 0x255   :  { %v973_v43 = vpop.permute.xlu1 %972 }
 0x256   :  { %v951_v44 = vpop.permute.xlu0 %950  ;;  %v979_v46 = vsel %vm461_vm7, %v973_v43, %v975_v33  ;;  %v980_v49 = vsel %vm461_vm7, %v971_v32, %v973_v43 }
 0x257   :  { %v982_v50 = vmul.f32 %v1696_v42, %v980_v49  ;;  %v983_v51 = vmul.f32 %v1686_v35, %v979_v46 }
 0x259   :  { %1045 = vmatprep.subr.mxu0 %v983_v51  ;;  %v977_v53 = vpop.permute.xlu1 %976 }
 0x25a   :  { %v955_v54 = vpop.permute.xlu0 %954  ;;  %v978_v55 = vsel %vm461_vm7, %v975_v33, %v977_v53  ;;  %v981_v56 = vsel %vm461_vm7, %v977_v53, %v971_v32  ;;  %1046 = vmatpush1.msra.mxu0 %v982_v50 }
 0x25b   :  { %v984_v58 = vmul.f32 %v1691_v36, %v978_v55  ;;  %v985_v61 = vmul.f32 %v1681_v34, %v981_v56 }
 0x25d   :  { %1116 = vmatprep.subr.mxu1 %v985_v61  ;;  %v953_v63 = vpop.permute.xlu1 %952 }
 0x25e   :  { %v931_v9 = vpop.permute.xlu0 %930  ;;  %v959_v35 = vsel %vm404_vm8, %v953_v63, %v955_v54  ;;  %v960_v42 = vsel %vm404_vm8, %v951_v44, %v953_v63  ;;  %1117 = vmatpush1.msra.mxu1 %v984_v58 }
 0x25f   :  { %v962_v17 = vmul.f32 %v960_v42, %v1722_v16  ;;  %v963_v29 = vmul.f32 %v959_v35, %v1716_v8 }
 0x261   :  { %1047 = vmatprep.subr.mxu0 %v963_v29  ;;  %v957_v4 = vpop.permute.xlu1 %956 }
 0x262   :  { %v935_v6 = vpop.permute.xlu0 %934  ;;  %v958_v34 = vsel %vm404_vm8, %v955_v54, %v957_v4  ;;  %v961_v36 = vsel %vm404_vm8, %v957_v4, %v951_v44  ;;  %1048 = vmatpush1.msra.mxu0 %v962_v17 }
 0x263   :  { %v964_v7 = vmul.f32 %v958_v34, %v1719_v11  ;;  %v965_v30 = vmul.f32 %v961_v36, %v1713_v3 }
 0x265   :  { %1118 = vmatprep.subr.mxu1 %v965_v30  ;;  %v933_v31 = vpop.permute.xlu1 %932 }
 0x266   :  { %v911_v32 = vpop.permute.xlu0 %910  ;;  %v939_v8 = vsel %vm347_vm1, %v933_v31, %v935_v6  ;;  %v940_v16 = vsel %vm347_vm1, %v931_v9, %v933_v31  ;;  %1119 = vmatpush1.msra.mxu1 %v964_v7 }
 0x267   :  { %v942_v33 = vmul.f32 %v940_v16, %v1513_v21  ;;  %v943_v43 = vmul.f32 %v939_v8, %v1507_v19 }
 0x269   :  { %1049 = vmatprep.subr.mxu0 %v943_v43  ;;  %v937_v44 = vpop.permute.xlu1 %936 }
 0x26a   :  { %v915_v46 = vpop.permute.xlu0 %914  ;;  %v938_v3 = vsel %vm347_vm1, %v935_v6, %v937_v44  ;;  %v941_v11 = vsel %vm347_vm1, %v937_v44, %v931_v9  ;;  %1050 = vmatpush1.msra.mxu0 %v942_v33 }
 0x26b   :  { %v944_v49 = vmul.f32 %v938_v3, %v1516_v22  ;;  %v945_v50 = vmul.f32 %v941_v11, %v1510_v20 }
 0x26d   :  { %1120 = vmatprep.subr.mxu1 %v945_v50  ;;  %v913_v51 = vpop.permute.xlu1 %912 }
 0x26e   :  { %v887_v53 = vpop.permute.xlu0 %886  ;;  %v919_v19 = vsel %vm290_vm2, %v913_v51, %v915_v46  ;;  %v920_v21 = vsel %vm290_vm2, %v911_v32, %v913_v51  ;;  %1121 = vmatpush1.msra.mxu1 %v944_v49 }
 0x26f   :  { %v922_v54 = vmul.f32 %v920_v21, %v1553_v41  ;;  %v923_v55 = vmul.f32 %v919_v19, %v1546_v38 }
 0x271   :  { %1051 = vmatprep.subr.mxu0 %v923_v55  ;;  %v917_v56 = vpop.permute.xlu1 %916 }
 0x272   :  { %v891_v58 = vpop.permute.xlu0 %890  ;;  %v918_v20 = vsel %vm290_vm2, %v915_v46, %v917_v56  ;;  %v921_v22 = vsel %vm290_vm2, %v917_v56, %v911_v32  ;;  %1052 = vmatpush1.msra.mxu0 %v922_v54 }
 0x273   :  { %v924_v61 = vmul.f32 %v918_v20, %v1549_v39  ;;  %v925_v63 = vmul.f32 %v921_v22, %v1543_v37  ;;  %1053 = vmatprep.subr.mxu0 %v1866_v14 }
 0x274   :  { %1054 = vmatpush1.msra.mxu0 %v1856_v25 }
 0x275   :  { %1122 = vmatprep.subr.mxu1 %v925_v63  ;;  %v889_v38 = vpop.permute.xlu1 %888 }
 0x276   :  { %v867_v41 = vpop.permute.xlu0 %866  ;;  %v896_v9 = vsel %vm225_vm3, %v887_v53, %v889_v38  ;;  %1123 = vmatpush1.msra.mxu1 %v924_v61  ;;  %v895_v37 = vsel %vm225_vm3, %v889_v38, %v891_v58 }
 0x277   :  { %v899_v35 = vmul.f32 %v896_v9, %v1571_v52  ;;  %1124 = vmatprep.subr.mxu1 %v1873_v5  ;;  %v900_v5 = vmul.f32 %v895_v37, %v1582_v59 }
 0x278   :  { %1125 = vmatpush1.msra.mxu1 %v1859_v28 }
 0x279   :  { %1055 = vmatprep.subr.mxu0 %v899_v35  ;;  %v893_v39 = vpop.permute.xlu1 %892 }
 0x27a   :  { %v871_v14 = vpop.permute.xlu0 %870  ;;  %v894_v25 = vsel %vm225_vm3, %v891_v58, %v893_v39  ;;  %v897_v42 = vsel %vm225_vm3, %v893_v39, %v887_v53 }
 0x27b   :  { %v898_v17 = vmul.f32 %v897_v42, %v1577_v57  ;;  %v901_v52 = vmul.f32 %v894_v25, %v1585_v60 }
 0x27d   :  { %1056 = vmatpush1.msra.mxu0 %v898_v17  ;;  %1126 = vmatprep.subr.mxu1 %v901_v52  ;;  %v869_v28 = vpop.permute.xlu1 %868 }
 0x27e   :  { %v847_v29 = vpop.permute.xlu0 %846  ;;  %v876_v4 = vsel %vm168_vm4, %v867_v41, %v869_v28  ;;  %1127 = vmatpush1.msra.mxu1 %v900_v5  ;;  %v875_v34 = vsel %vm168_vm4, %v869_v28, %v871_v14 }
 0x27f   :  { %v879_v6 = vmul.f32 %v876_v4, %v1602_v15  ;;  %v880_v30 = vmul.f32 %v875_v34, %v1611_v26 }
 0x281   :  { %1057 = vmatprep.subr.mxu0 %v879_v6  ;;  %v873_v36 = vpop.permute.xlu1 %872 }
 0x282   :  { %v874_v57 = vsel %vm168_vm4, %v871_v14, %v873_v36  ;;  %v877_v59 = vsel %vm168_vm4, %v873_v36, %v867_v41  ;;  %v851_v31 = vpop.permute.xlu0 %850 }
 0x283   :  { %v878_v60 = vmul.f32 %v877_v59, %v1607_v24  ;;  %v881_v7 = vmul.f32 %v874_v57, %v1614_v27 }
 0x285   :  { %1058 = vmatpush1.msra.mxu0 %v878_v60  ;;  %1128 = vmatprep.subr.mxu1 %v881_v7  ;;  %v849_v15 = vpop.permute.xlu1 %848 }
 0x286   :  { %v856_v32 = vsel %vm111_vm5, %v847_v29, %v849_v15  ;;  %1129 = vmatpush1.msra.mxu1 %v880_v30  ;;  %v855_v16 = vsel %vm111_vm5, %v849_v15, %v851_v31  ;;  %v827_v24 = vpop.permute.xlu0 %826 }
 0x287   :  { %v859_v8 = vmul.f32 %v856_v32, %v1628_v40  ;;  %v860_v46 = vmul.f32 %v855_v16, %v1637_v47  ;;  %v1273_v16 = vld [vmem:[%s2076_s0] sm:$0xff] }
 0x289   :  { %1059 = vmatprep.subr.mxu0 %v859_v8  ;;  %v853_v33 = vpop.permute.xlu1 %852 }
 0x28a   :  { %v854_v27 = vsel %vm111_vm5, %v851_v31, %v853_v33  ;;  %v857_v26 = vsel %vm111_vm5, %v853_v33, %v847_v29  ;;  %v831_v49 = vpop.permute.xlu0 %830 }
 0x28b   :  { %v858_v43 = vmul.f32 %v857_v26, %v1633_v45  ;;  %v861_v44 = vmul.f32 %v854_v27, %v1640_v48  ;;  %v1274_v26 = vld [vmem:[%s2076_s0 + $0x10] sm:$0xff] }
 0x28d   :  { %1060 = vmatpush1.msra.mxu0 %v858_v43  ;;  %1130 = vmatprep.subr.mxu1 %v861_v44  ;;  %v829_v40 = vpop.permute.xlu1 %828 }
 0x28e   :  { %v836_v3 = vsel %vm54_vm6, %v827_v24, %v829_v40  ;;  %1131 = vmatpush1.msra.mxu1 %v860_v46  ;;  %v835_v50 = vsel %vm54_vm6, %v829_v40, %v831_v49 }
 0x28f   :  { %v839_v11 = vmul.f32 %v836_v3, %v1654_v62  ;;  %v990_v62 = vld [vmem:[%s2080_s3] sm:$0xff]  ;;  %v840_v19 = vmul.f32 %v835_v50, %v1663_v1  ;;  %v1275_v3 = vld [vmem:[%s2076_s0 + $0x8] sm:$0xff] }
 0x291   :  { %1061 = vmatprep.subr.mxu0 %v839_v11  ;;  %v833_v51 = vpop.permute.xlu1 %832 }
 0x292   :  { %v834_v45 = vsel %vm54_vm6, %v831_v49, %v833_v51  ;;  %v837_v47 = vsel %vm54_vm6, %v833_v51, %v827_v24  ;;  %v1276_v51 = vld [vmem:[%s2076_s0 + $0x18] sm:$0xff] }
 0x293   :  { %v838_v48 = vmul.f32 %v837_v47, %v1660_v2  ;;  %v841_v53 = vmul.f32 %v834_v45, %v1666_v0 }
 0x295   :  { %1062 = vmatpush1.msra.mxu0 %v838_v48  ;;  %1132 = vmatprep.subr.mxu1 %v841_v53 }
 0x296   :  { %1219 = vmatmul.mubr.msk.f32.vlgmr.msra.gmra.mxu0 %vm1027_vm9, %v990_v62  ;;  %1133 = vmatpush1.msra.mxu1 %v840_v19 }
 0x297   :  { %1220 = vmatmul.mubr.msk.f32.vlgmr.msra.gmra.mxu1 %vm1027_vm9, %v990_v62  ;;  %v586_v21 = vpop.permute.xlu0 %585 }
 0x298   :  { %v675_v10 = vadd.f32 %v1847_v18, %v586_v21  ;;  %v758_v54 = vadd.f32 %v1849_v23, %v586_v21  ;;  %v677_v2 = vadd.f32 %v1851_v13, %v586_v21  ;;  %v760_v0 = vadd.f32 %v1853_v12, %v586_v21 }
 0x29a   :  { %v1211_v55 = vmul.f32 -1.442695, %v675_v10  ;;  %v1213_v56 = vmul.f32 -1.442695, %v758_v54  ;;  %v1212_v58 = vmul.f32 -1.442695, %v677_v2 }
 0x29b   :  { %v1214_v20 = vmul.f32 -1.442695, %v760_v0 }
 0x29c   :  { %1249 = vpow2.f32 %v1211_v55 }
 0x29d   :  { %1251 = vpow2.f32 %v1213_v56 }
 0x29e   :  { %1253 = vpow2.f32 %v1212_v58  ;;  %v596_v23 = vpop.permute.xlu1 %595 }
 0x29f   :  { %1255 = vpow2.f32 %v1214_v20 }
 0x2a1   :  { %v686_v63 = vpop.f32.mrf.mxu0 }
 0x2a2   :  { %v769_v13 = vpop.f32.mrf.mxu1  ;;  %v687_v37 = vadd.f32 %v686_v63, %v596_v23 }
 0x2a3   :  { %v688_v12 = vpop.f32.mrf.mxu0  ;;  %v770_v25 = vadd.f32 %v769_v13, %v596_v23 }
 0x2a4   :  { %v771_v39 = vpop.f32.mrf.mxu1  ;;  %v689_v52 = vadd.f32 %v688_v12, %v596_v23 }
 0x2a5   :  { %v772_v29 = vadd.f32 %v771_v39, %v596_v23 }
 0x2a9   :  { %v1250_v1 = vpop.eup %1249 }
 0x2aa   :  { %v1252_v22 = vpop.eup %1251  ;;  %v786_v18 = vadd.f32 1.0, %v1250_v1 }
 0x2ab   :  { %v1254_v61 = vpop.eup %1253  ;;  %v788_v41 = vadd.f32 1.0, %v1252_v22 }
 0x2ac   :  { %v1256_v38 = vpop.eup %1255  ;;  %v787_v9 = vadd.f32 1.0, %v1254_v61  ;;  %1257 = vrcp.f32 %v786_v18 }
 0x2ad   :  { %v789_v35 = vadd.f32 1.0, %v1256_v38  ;;  %1259 = vrcp.f32 %v788_v41 }
 0x2ae   :  { %1261 = vrcp.f32 %v787_v9 }
 0x2af   :  { %1263 = vrcp.f32 %v789_v35 }
 0x2b9   :  { %v1258_v36 = vpop.eup %1257 }
 0x2ba   :  { %v1260_v57 = vpop.eup %1259  ;;  %v1177_v7 = vsub.f32 1.0, %v1258_v36 }
 0x2bb   :  { %v1262_v59 = vpop.eup %1261  ;;  %v1179_v30 = vsub.f32 1.0, %v1260_v57 }
 0x2bc   :  { %v1264_v60 = vpop.eup %1263  ;;  %v1178_v31 = vsub.f32 1.0, %v1262_v59  ;;  %v1181_v33 = vmul.f32 %v1273_v16, %v1177_v7 }
 0x2bd   :  { %v1180_v32 = vsub.f32 1.0, %v1264_v60  ;;  %v1183_v43 = vmul.f32 %v1274_v26, %v1179_v30 }
 0x2be   :  { %v1182_v11 = vmul.f32 %v1275_v3, %v1178_v31 }
 0x2bf   :  { %v1184_v45 = vmul.f32 %v1276_v51, %v1180_v32 }
 0x356   :  { %v1097_v14 = vpop.f32.mrf.mxu0 }
 0x357   :  { %v1098_v42 = vadd.f32 %v1097_v14, %v687_v37  ;;  %v1168_v17 = vpop.f32.mrf.mxu1 }
 0x358   :  { %v1169_v5 = vadd.f32 %v1168_v17, %v770_v25  ;;  %v1099_v28 = vpop.f32.mrf.mxu0 }
 0x359   :  { %1265 = vtanh.f32 %v1098_v42  ;;  %v1100_v4 = vadd.f32 %v1099_v28, %v689_v52  ;;  %v1170_v6 = vpop.f32.mrf.mxu1 }
 0x35a   :  { %1267 = vtanh.f32 %v1169_v5  ;;  %v1171_v34 = vadd.f32 %v1170_v6, %v772_v29 }
 0x35b   :  { %1269 = vtanh.f32 %v1100_v4 }
 0x35c   :  { %1271 = vtanh.f32 %v1171_v34 }
 0x366   :  { %v1266_v15 = vpop.eup %1265 }
 0x367   :  { %v1268_v8 = vpop.eup %1267  ;;  %v1185_v24 = vmul.f32 %v1266_v15, %v1258_v36 }
 0x368   :  { %v1270_v27 = vpop.eup %1269  ;;  %v1187_v44 = vmul.f32 %v1268_v8, %v1260_v57 }
 0x369   :  { %v1272_v46 = vpop.eup %1271  ;;  %v1189_v40 = vadd.f32 %v1185_v24, %v1181_v33  ;;  %v1186_v49 = vmul.f32 %v1270_v27, %v1262_v59 }
 0x36a   :  { %v1191_v50 = vadd.f32 %v1187_v44, %v1183_v43  ;;  %v1188_v47 = vmul.f32 %v1272_v46, %v1264_v60 }
 0x36b   :  { %1193 = vst [vmem:[%s2081_s5] sm:$0xff] %v1189_v40  ;;  %v1190_v48 = vadd.f32 %v1186_v49, %v1182_v11 }
 0x36c   :  { %1195 = vst [vmem:[%s2081_s5 + $0x10] sm:$0xff] %v1191_v50  ;;  %v1192_v53 = vadd.f32 %v1188_v47, %v1184_v45 }
 0x36d   :  { %1194 = vst [vmem:[%s2081_s5 + $0x8] sm:$0xff] %v1190_v48 }
 0x36e   :  { %1196 = vst [vmem:[%s2081_s5 + $0x18] sm:$0xff] %v1192_v53 }

</bundles_post_ra>
